<compile_context>
chip_gen: v7x
topology: tpu7x:2x2x1
jax: 0.10.0
libtpu: 0.0.40
codegen_flags: <defaults>
</compile_context>

<pallas_src>
import math
import functools
from functools import partial

import numpy as np
import jax
import jax.numpy as jnp
from jax.experimental import pallas as pl
from jax.experimental.pallas import tpu as pltpu

EPS = 1e-5
NUM_NORM_GROUPS = 4
_SPB_CAP = 2          # samples per input tensor per grid step (x2 folded with masks)


def _build_tap_masks(H, W, K, pad):
    """(K*K, H*W) float mask; mask[t, p] = 1 iff tap t reads a valid (unpadded) pixel."""
    masks = np.zeros((K * K, H * W), np.float32)
    r = np.arange(H)[:, None]
    c = np.arange(W)[None, :]
    for kh in range(K):
        for kw in range(K):
            dy, dx = kh - pad, kw - pad
            valid = (r + dy >= 0) & (r + dy < H) & (c + dx >= 0) & (c + dx < W)
            masks[kh * K + kw] = valid.astype(np.float32).reshape(-1)
    return masks


@functools.lru_cache(maxsize=1)
def _grid_steps_wanted():
    # v7x has 2 TensorCores per chip (want a >=2-wide parallel grid); v5e/v6e
    # have 1, where a 1-step grid avoids an extra ~0.35us sequential step.
    try:
        kind = jax.devices()[0].device_kind.lower()
    except Exception:
        return 1
    return 2 if "v7" in kind else 1


def _make_fused_kernel(W, K, pad, HW, sc_half, cg, eps=EPS):
    """sc_half = spb*C rows per input tensor; folded slab has SC = 2*sc_half rows."""
    SC = 2 * sc_half
    inv_cnt = 1.0 / float(cg * HW)

    def kernel(img_ref, msk_ref, wtap_ref, pwbd_ref, cp_ref, oimg_ref, omsk_ref):
        # All per-row (sample, channel) parameters, pre-tiled in the wrapper.
        cp = cp_ref[...]                                   # (SC, 7)
        dw_b, g1, b1 = cp[:, 0:1], cp[:, 1:2], cp[:, 2:3]
        pw_b, g2, b2 = cp[:, 3:4], cp[:, 4:5], cp[:, 5:6]
        gpos = cp[:, 6:7]                                  # position inside norm group
        pwbd = pwbd_ref[...]                               # (SC, SC) block-diag 1x1 weight

        # Fold images + masks into one (samples*channels, H*W) slab (VMEM-only).
        x = jnp.concatenate([img_ref[...], msk_ref[...]], axis=0)    # (SC, HW)

        lane01 = jax.lax.broadcasted_iota(jnp.int32, (SC, 2), 1)

        def group_reduce(v):          # (SC, L) -> per-row sum over its (sample, group)
            total = v
            for m in range(1, cg):
                up = pltpu.roll(v, shift=(SC - m) % SC, axis=0)      # up[i] = v[i + m]
                dn = pltpu.roll(v, shift=m, axis=0)                  # dn[i] = v[i - m]
                total = (total
                         + jnp.where(gpos + m < cg, up, 0.0)
                         + jnp.where(gpos >= m, dn, 0.0))
            return total

        def group_norm_relu6(y, gamma, beta):
            s = jnp.sum(y, axis=1, keepdims=True)                    # (SC, 1)
            sq = jnp.sum(y * y, axis=1, keepdims=True)               # (SC, 1)
            stats = jnp.where(lane01 == 0, s, sq)                    # (SC, 2) packed
            red = group_reduce(stats) * inv_cnt                      # one reduce for both
            mu, ex2 = red[:, 0:1], red[:, 1:2]
            var = jnp.maximum(ex2 - mu * mu, 0.0)
            a = jax.lax.rsqrt(var + eps) * gamma                     # (SC, 1)
            b = beta - mu * a
            return jnp.clip(y * a + b, 0.0, 6.0)

        # Depthwise KxK conv (stride 1, zero 'same' padding): lane rolls of the
        # flattened image times pre-multiplied (halo-mask x tap-weight) slabs.
        acc = x * wtap_ref[pad * K + pad]                            # centre tap: no roll
        for kh in range(K):
            for kw in range(K):
                d = (kh - pad) * W + (kw - pad)
                if d == 0:
                    continue
                xt = pltpu.roll(x, shift=(-d) % HW, axis=1)          # xt[p] = x[p + d]
                acc = acc + xt * wtap_ref[kh * K + kw]
        x1 = group_norm_relu6(acc + dw_b, g1, b1)

        # 1x1 pointwise conv on the MXU: block-diagonal weight applies pw_w
        # independently to every folded sample.  HIGHEST keeps f32 accuracy.
        y = jnp.dot(pwbd, x1, precision=jax.lax.Precision.HIGHEST,
                    preferred_element_type=jnp.float32)
        out = group_norm_relu6(y + pw_b, g2, b2)

        oimg_ref[...] = out[:sc_half]
        omsk_ref[...] = out[sc_half:]

    return kernel


@partial(jax.jit, static_argnames=("spb", "stride", "padding", "num_groups"))
def _forward_impl(images, masks, params, *, spb, stride, padding, num_groups):
    N, C, H, W = images.shape
    K = math.isqrt(params["dw_w"].shape[1])
    HW = H * W
    cg = C // num_groups
    S = 2 * spb                      # images + masks samples folded per grid step
    f32 = jnp.float32

    # Pre-multiplied (halo mask x depthwise tap weight), tiled over the folded
    # sample axis so the kernel needs no per-sample broadcasts at all.
    tapmask = jnp.asarray(_build_tap_masks(H, W, K, padding))            # (KK, HW)
    dw_w = params["dw_w"].astype(f32)                                    # (C, KK)
    wtap = jnp.tile(dw_w.T[:, :, None] * tapmask[:, None, :], (1, S, 1))  # (KK, S*C, HW)

    # Block-diagonal 1x1-conv weight: applies pw_w to each folded sample.
    pwbd = jnp.kron(jnp.eye(S, dtype=f32), params["pw_w"].astype(f32))    # (S*C, S*C)

    gpos = np.tile((np.arange(C) % cg).astype(np.float32), S)[:, None]    # (S*C, 1)
    per_ch = jnp.stack([params["dw_b"], params["gn1_g"], params["gn1_b"],
                        params["pw_b"], params["gn2_g"], params["gn2_b"]],
                       axis=1).astype(f32)                                # (C, 6)
    cvec = jnp.concatenate([jnp.tile(per_ch, (S, 1)), jnp.asarray(gpos)], axis=1)

    # Lane-dense 2D views (free reshapes): rows = (sample, channel), lanes = H*W.
    img2 = images.reshape(N * C, HW).astype(f32)
    msk2 = masks.reshape(N * C, HW).astype(f32)

    blk = (spb * C, HW)
    out_img, out_msk = pl.pallas_call(
        _make_fused_kernel(W, K, padding, HW, spb * C, cg),
        out_shape=(jax.ShapeDtypeStruct((N * C, HW), f32),
                   jax.ShapeDtypeStruct((N * C, HW), f32)),
        grid_spec=pltpu.PrefetchScalarGridSpec(
            num_scalar_prefetch=0,
            grid=(N // spb,),
            in_specs=[
                pl.BlockSpec(blk, lambda n: (n, 0)),
                pl.BlockSpec(blk, lambda n: (n, 0)),
                pl.BlockSpec((K * K, S * C, HW), lambda n: (0, 0, 0)),   # resident consts
                pl.BlockSpec((S * C, S * C), lambda n: (0, 0)),
                pl.BlockSpec((S * C, 7), lambda n: (0, 0)),
            ],
            out_specs=[pl.BlockSpec(blk, lambda n: (n, 0)),
                       pl.BlockSpec(blk, lambda n: (n, 0))],
        ),
        compiler_params=pltpu.CompilerParams(dimension_semantics=("parallel",)),
    )(img2, msk2, wtap, pwbd, cvec)

    out_img = out_img.reshape(N, C, H, W).astype(images.dtype)
    out_msk = out_msk.reshape(N, C, H, W).astype(masks.dtype)
    return out_img, out_msk


def depthwise_separable_conv_forward(images, masks, params, *, stride, padding,
                                     num_groups=NUM_NORM_GROUPS):
    """Mirrors Depthwise_separable_conv.forward (same weights applied to both inputs).

    Weight layouts (vs. torch):
      dw_w: (C, K*K)      == depthwise_conv[0].weight.reshape(C, K*K)
      pw_w: (C_out, C_in) == pointwise_conv[0].weight[:, :, 0, 0]
      dw_b / pw_b / gn{1,2}_g / gn{1,2}_b: (C,)
    """
    assert images.shape == masks.shape
    N, C, H, W = images.shape
    K = math.isqrt(params["dw_w"].shape[1])
    # TODO(synk): general stride / non-'same' padding / grouped (non-depthwise)
    # first conv are not implemented in the Pallas path; the module config used
    # here (stride=1, padding=(K-1)//2, groups=C) is the depthwise-separable case.
    assert stride == 1 and 2 * padding == K - 1
    assert C % num_groups == 0

    want = _grid_steps_wanted()
    spb = 1
    for cand in range(2, _SPB_CAP + 1):
        if N % cand == 0 and N // cand >= want:
            spb = cand
    return _forward_impl(images, masks, params, spb=spb, stride=stride,
                         padding=padding, num_groups=num_groups)


# ---------------- pure-JAX reference (for in-script verification) ----------------
def _gn_relu6_ref(x, gamma, beta, num_groups, eps=EPS):
    N, C, H, W = x.shape
    xg = x.reshape(N, num_groups, -1)
    mu = xg.mean(axis=2, keepdims=True)
    var = ((xg - mu) ** 2).mean(axis=2, keepdims=True)
    xn = ((xg - mu) * jax.lax.rsqrt(var + eps)).reshape(N, C, H, W)
    return jnp.clip(xn * gamma.reshape(1, C, 1, 1) + beta.reshape(1, C, 1, 1), 0.0, 6.0)


def _reference_single(x, params, *, stride, padding, num_groups=NUM_NORM_GROUPS):
    N, C, H, W = x.shape
    K = math.isqrt(params["dw_w"].shape[1])
    dw = params["dw_w"].reshape(C, 1, K, K)
    y = jax.lax.conv_general_dilated(
        x, dw, window_strides=(stride, stride),
        padding=[(padding, padding), (padding, padding)],
        dimension_numbers=("NCHW", "OIHW", "NCHW"), feature_group_count=C)
    y = _gn_relu6_ref(y + params["dw_b"].reshape(1, C, 1, 1),
                      params["gn1_g"], params["gn1_b"], num_groups)
    pw = params["pw_w"].reshape(C, C, 1, 1)
    z = jax.lax.conv_general_dilated(
        y, pw, (1, 1), [(0, 0), (0, 0)],
        dimension_numbers=("NCHW", "OIHW", "NCHW"))
    z = _gn_relu6_ref(z + params["pw_b"].reshape(1, C, 1, 1),
                      params["gn2_g"], params["gn2_b"], num_groups)
    return z


if __name__ == "__main__":
    # Module config: in_channels=8, out_channels=8, kernel_size=3, stride=1,
    # padding=1, groups=8 (depthwise); both GroupNorms use 4 groups of 2 channels.
    N, C, H, W, K = 2, 8, 16, 16, 3
    stride, padding = 1, 1

    key = jax.random.PRNGKey(0)
    ks = jax.random.split(key, 10)

    images = jax.random.normal(ks[0], (N, C, H, W), jnp.float32)
    masks = (jax.random.uniform(ks[1], (N, C, H, W)) > 0.5).astype(jnp.float32)

    params = {
        "dw_w": jax.random.normal(ks[2], (C, K * K), jnp.float32) * 0.2,
        "dw_b": jax.random.normal(ks[3], (C,), jnp.float32) * 0.1,
        "pw_w": jax.random.normal(ks[4], (C, C), jnp.float32) * 0.2,
        "pw_b": jax.random.normal(ks[5], (C,), jnp.float32) * 0.1,
        "gn1_g": 1.0 + 0.1 * jax.random.normal(ks[6], (C,), jnp.float32),
        "gn1_b": 0.1 * jax.random.normal(ks[7], (C,), jnp.float32),
        "gn2_g": 1.0 + 0.1 * jax.random.normal(ks[8], (C,), jnp.float32),
        "gn2_b": 0.1 * jax.random.normal(ks[9], (C,), jnp.float32),
    }

    out_images, out_masks = depthwise_separable_conv_forward(
        images, masks, params, stride=stride, padding=padding)
    jax.block_until_ready((out_images, out_masks))

    assert out_images.shape == (N, C, H, W) and out_masks.shape == (N, C, H, W)
    assert bool(jnp.all(jnp.isfinite(out_images))) and bool(jnp.all(jnp.isfinite(out_masks)))

    # Verify against a pure-JAX/XLA implementation of the PyTorch module.
    ref_images = _reference_single(images, params, stride=stride, padding=padding)
    ref_masks = _reference_single(masks, params, stride=stride, padding=padding)
    err = max(float(jnp.max(jnp.abs(out_images - ref_images))),
              float(jnp.max(jnp.abs(out_masks - ref_masks))))
    assert err < 2e-3, f"mismatch vs reference: max abs err {err}"
    print("KERNEL_OK")
</pallas_src>

<mosaic_0001>
module attributes {stable_mosaic.version = 11 : i64} {
  func.func @kernel(%arg0: i32, %arg1: memref<16x256xf32, #tpu.memory_space<vmem>>, %arg2: memref<16x256xf32, #tpu.memory_space<vmem>>, %arg3: memref<9x32x256xf32, #tpu.memory_space<vmem>>, %arg4: memref<32x32xf32, #tpu.memory_space<vmem>>, %arg5: memref<32x7xf32, #tpu.memory_space<vmem>>, %arg6: memref<16x256xf32, #tpu.memory_space<vmem>>, %arg7: memref<16x256xf32, #tpu.memory_space<vmem>>) attributes {dimension_semantics = [#tpu.dimension_semantics<parallel>], iteration_bounds = array<i64: 1>, scalar_prefetch = 0 : i64, scratch_operands = 0 : i64, tpu.core_type = #tpu.core_type<tc>, window_params = [{transform_indices = @transform_0, window_bounds = array<i64: 16, 256>}, {transform_indices = @transform_1, window_bounds = array<i64: 16, 256>}, {pipeline_mode = #tpu.pipeline_mode<synchronous>, transform_indices = @transform_2, window_bounds = array<i64: 9, 32, 256>}, {pipeline_mode = #tpu.pipeline_mode<synchronous>, transform_indices = @transform_3, window_bounds = array<i64: 32, 32>}, {pipeline_mode = #tpu.pipeline_mode<synchronous>, transform_indices = @transform_4, window_bounds = array<i64: 32, 7>}, {transform_indices = @transform_5, window_bounds = array<i64: 16, 256>}, {transform_indices = @transform_6, window_bounds = array<i64: 16, 256>}]} {
    %c0 = arith.constant 0 : index
    %c0_0 = arith.constant 0 : index
    %0 = vector.load %arg5[%c0, %c0_0] : memref<32x7xf32, #tpu.memory_space<vmem>>, vector<32x7xf32>
    %1 = vector.extract_strided_slice %0 {offsets = [0, 0], sizes = [32, 1], strides = [1, 1]} : vector<32x7xf32> to vector<32x1xf32>
    %2 = vector.extract_strided_slice %0 {offsets = [0, 1], sizes = [32, 1], strides = [1, 1]} : vector<32x7xf32> to vector<32x1xf32>
    %3 = vector.extract_strided_slice %0 {offsets = [0, 2], sizes = [32, 1], strides = [1, 1]} : vector<32x7xf32> to vector<32x1xf32>
    %4 = vector.extract_strided_slice %0 {offsets = [0, 3], sizes = [32, 1], strides = [1, 1]} : vector<32x7xf32> to vector<32x1xf32>
    %5 = vector.extract_strided_slice %0 {offsets = [0, 4], sizes = [32, 1], strides = [1, 1]} : vector<32x7xf32> to vector<32x1xf32>
    %6 = vector.extract_strided_slice %0 {offsets = [0, 5], sizes = [32, 1], strides = [1, 1]} : vector<32x7xf32> to vector<32x1xf32>
    %7 = vector.extract_strided_slice %0 {offsets = [0, 6], sizes = [32, 1], strides = [1, 1]} : vector<32x7xf32> to vector<32x1xf32>
    %c0_1 = arith.constant 0 : index
    %c0_2 = arith.constant 0 : index
    %8 = vector.load %arg4[%c0_1, %c0_2] : memref<32x32xf32, #tpu.memory_space<vmem>>, vector<32x32xf32>
    %c0_3 = arith.constant 0 : index
    %c0_4 = arith.constant 0 : index
    %9 = vector.load %arg1[%c0_3, %c0_4] : memref<16x256xf32, #tpu.memory_space<vmem>>, vector<16x256xf32>
    %c0_5 = arith.constant 0 : index
    %c0_6 = arith.constant 0 : index
    %10 = vector.load %arg2[%c0_5, %c0_6] : memref<16x256xf32, #tpu.memory_space<vmem>>, vector<16x256xf32>
    %11 = tpu.concatenate %9, %10 in 0 : vector<16x256xf32>, vector<16x256xf32> -> vector<32x256xf32>
    %12 = tpu.iota {dimensions = array<i32: 1>} : vector<32x2xi32>
    %c4 = arith.constant 4 : index
    %c0_7 = arith.constant 0 : index
    %c0_8 = arith.constant 0 : index
    %13 = vector.load %arg3[%c4, %c0_7, %c0_8] : memref<9x32x256xf32, #tpu.memory_space<vmem>>, vector<1x32x256xf32>
    %14 = vector.shape_cast %13 : vector<1x32x256xf32> to vector<32x256xf32>
    %15 = arith.mulf %11, %14 : vector<32x256xf32>
    %c17_i32 = arith.constant 17 : i32
    %16 = tpu.dynamic_rotate %11 by %c17_i32 dim 1 : vector<32x256xf32>, i32 -> vector<32x256xf32>
    %c0_9 = arith.constant 0 : index
    %c0_10 = arith.constant 0 : index
    %c0_11 = arith.constant 0 : index
    %17 = vector.load %arg3[%c0_9, %c0_10, %c0_11] : memref<9x32x256xf32, #tpu.memory_space<vmem>>, vector<1x32x256xf32>
    %18 = vector.shape_cast %17 : vector<1x32x256xf32> to vector<32x256xf32>
    %19 = arith.mulf %16, %18 : vector<32x256xf32>
    %20 = arith.addf %15, %19 : vector<32x256xf32>
    %c16_i32 = arith.constant 16 : i32
    %21 = tpu.dynamic_rotate %11 by %c16_i32 dim 1 : vector<32x256xf32>, i32 -> vector<32x256xf32>
    %c1 = arith.constant 1 : index
    %c0_12 = arith.constant 0 : index
    %c0_13 = arith.constant 0 : index
    %22 = vector.load %arg3[%c1, %c0_12, %c0_13] : memref<9x32x256xf32, #tpu.memory_space<vmem>>, vector<1x32x256xf32>
    %23 = vector.shape_cast %22 : vector<1x32x256xf32> to vector<32x256xf32>
    %24 = arith.mulf %21, %23 : vector<32x256xf32>
    %25 = arith.addf %20, %24 : vector<32x256xf32>
    %c15_i32 = arith.constant 15 : i32
    %26 = tpu.dynamic_rotate %11 by %c15_i32 dim 1 : vector<32x256xf32>, i32 -> vector<32x256xf32>
    %c2 = arith.constant 2 : index
    %c0_14 = arith.constant 0 : index
    %c0_15 = arith.constant 0 : index
    %27 = vector.load %arg3[%c2, %c0_14, %c0_15] : memref<9x32x256xf32, #tpu.memory_space<vmem>>, vector<1x32x256xf32>
    %28 = vector.shape_cast %27 : vector<1x32x256xf32> to vector<32x256xf32>
    %29 = arith.mulf %26, %28 : vector<32x256xf32>
    %30 = arith.addf %25, %29 : vector<32x256xf32>
    %c1_i32 = arith.constant 1 : i32
    %31 = tpu.dynamic_rotate %11 by %c1_i32 dim 1 : vector<32x256xf32>, i32 -> vector<32x256xf32>
    %c3 = arith.constant 3 : index
    %c0_16 = arith.constant 0 : index
    %c0_17 = arith.constant 0 : index
    %32 = vector.load %arg3[%c3, %c0_16, %c0_17] : memref<9x32x256xf32, #tpu.memory_space<vmem>>, vector<1x32x256xf32>
    %33 = vector.shape_cast %32 : vector<1x32x256xf32> to vector<32x256xf32>
    %34 = arith.mulf %31, %33 : vector<32x256xf32>
    %35 = arith.addf %30, %34 : vector<32x256xf32>
    %c255_i32 = arith.constant 255 : i32
    %36 = tpu.dynamic_rotate %11 by %c255_i32 dim 1 : vector<32x256xf32>, i32 -> vector<32x256xf32>
    %c5 = arith.constant 5 : index
    %c0_18 = arith.constant 0 : index
    %c0_19 = arith.constant 0 : index
    %37 = vector.load %arg3[%c5, %c0_18, %c0_19] : memref<9x32x256xf32, #tpu.memory_space<vmem>>, vector<1x32x256xf32>
    %38 = vector.shape_cast %37 : vector<1x32x256xf32> to vector<32x256xf32>
    %39 = arith.mulf %36, %38 : vector<32x256xf32>
    %40 = arith.addf %35, %39 : vector<32x256xf32>
    %c241_i32 = arith.constant 241 : i32
    %41 = tpu.dynamic_rotate %11 by %c241_i32 dim 1 : vector<32x256xf32>, i32 -> vector<32x256xf32>
    %c6 = arith.constant 6 : index
    %c0_20 = arith.constant 0 : index
    %c0_21 = arith.constant 0 : index
    %42 = vector.load %arg3[%c6, %c0_20, %c0_21] : memref<9x32x256xf32, #tpu.memory_space<vmem>>, vector<1x32x256xf32>
    %43 = vector.shape_cast %42 : vector<1x32x256xf32> to vector<32x256xf32>
    %44 = arith.mulf %41, %43 : vector<32x256xf32>
    %45 = arith.addf %40, %44 : vector<32x256xf32>
    %c240_i32 = arith.constant 240 : i32
    %46 = tpu.dynamic_rotate %11 by %c240_i32 dim 1 : vector<32x256xf32>, i32 -> vector<32x256xf32>
    %c7 = arith.constant 7 : index
    %c0_22 = arith.constant 0 : index
    %c0_23 = arith.constant 0 : index
    %47 = vector.load %arg3[%c7, %c0_22, %c0_23] : memref<9x32x256xf32, #tpu.memory_space<vmem>>, vector<1x32x256xf32>
    %48 = vector.shape_cast %47 : vector<1x32x256xf32> to vector<32x256xf32>
    %49 = arith.mulf %46, %48 : vector<32x256xf32>
    %50 = arith.addf %45, %49 : vector<32x256xf32>
    %c239_i32 = arith.constant 239 : i32
    %51 = tpu.dynamic_rotate %11 by %c239_i32 dim 1 : vector<32x256xf32>, i32 -> vector<32x256xf32>
    %c8 = arith.constant 8 : index
    %c0_24 = arith.constant 0 : index
    %c0_25 = arith.constant 0 : index
    %52 = vector.load %arg3[%c8, %c0_24, %c0_25] : memref<9x32x256xf32, #tpu.memory_space<vmem>>, vector<1x32x256xf32>
    %53 = vector.shape_cast %52 : vector<1x32x256xf32> to vector<32x256xf32>
    %54 = arith.mulf %51, %53 : vector<32x256xf32>
    %55 = arith.addf %50, %54 : vector<32x256xf32>
    %56 = vector.broadcast %1 : vector<32x1xf32> to vector<32x256xf32>
    %57 = arith.addf %55, %56 : vector<32x256xf32>
    %cst = arith.constant dense<0.000000e+00> : vector<32xf32>
    %58 = vector.multi_reduction <add>, %57, %cst [1] : vector<32x256xf32> to vector<32xf32>
    %59 = vector.shape_cast %58 : vector<32xf32> to vector<32x1xf32>
    %60 = arith.mulf %57, %57 : vector<32x256xf32>
    %cst_26 = arith.constant dense<0.000000e+00> : vector<32xf32>
    %61 = vector.multi_reduction <add>, %60, %cst_26 [1] : vector<32x256xf32> to vector<32xf32>
    %62 = vector.shape_cast %61 : vector<32xf32> to vector<32x1xf32>
    %c0_i32 = arith.constant 0 : i32
    %63 = vector.broadcast %c0_i32 : i32 to vector<32x2xi32>
    %64 = arith.cmpi eq, %12, %63 : vector<32x2xi32>
    %65 = vector.shape_cast %59 : vector<32x1xf32> to vector<32x1xf32>
    %66 = vector.broadcast %65 : vector<32x1xf32> to vector<32x2xf32>
    %67 = vector.shape_cast %62 : vector<32x1xf32> to vector<32x1xf32>
    %68 = vector.broadcast %67 : vector<32x1xf32> to vector<32x2xf32>
    %69 = arith.select %64, %66, %68 : vector<32x2xi1>, vector<32x2xf32>
    %c31_i32 = arith.constant 31 : i32
    %70 = tpu.dynamic_rotate %69 by %c31_i32 dim 0 : vector<32x2xf32>, i32 -> vector<32x2xf32>
    %c1_i32_27 = arith.constant 1 : i32
    %71 = tpu.dynamic_rotate %69 by %c1_i32_27 dim 0 : vector<32x2xf32>, i32 -> vector<32x2xf32>
    %cst_28 = arith.constant 1.000000e+00 : f32
    %72 = vector.broadcast %cst_28 : f32 to vector<32x1xf32>
    %73 = arith.addf %7, %72 : vector<32x1xf32>
    %cst_29 = arith.constant 2.000000e+00 : f32
    %74 = vector.broadcast %cst_29 : f32 to vector<32x1xf32>
    %75 = arith.cmpf olt, %73, %74 : vector<32x1xf32>
    %cst_30 = arith.constant 0.000000e+00 : f32
    %76 = vector.shape_cast %75 : vector<32x1xi1> to vector<32x1xi1>
    %77 = vector.broadcast %76 : vector<32x1xi1> to vector<32x2xi1>
    %78 = vector.broadcast %cst_30 : f32 to vector<32x2xf32>
    %79 = arith.select %77, %70, %78 : vector<32x2xi1>, vector<32x2xf32>
    %80 = arith.addf %69, %79 : vector<32x2xf32>
    %cst_31 = arith.constant 1.000000e+00 : f32
    %81 = vector.broadcast %cst_31 : f32 to vector<32x1xf32>
    %82 = arith.cmpf oge, %7, %81 : vector<32x1xf32>
    %cst_32 = arith.constant 0.000000e+00 : f32
    %83 = vector.shape_cast %82 : vector<32x1xi1> to vector<32x1xi1>
    %84 = vector.broadcast %83 : vector<32x1xi1> to vector<32x2xi1>
    %85 = vector.broadcast %cst_32 : f32 to vector<32x2xf32>
    %86 = arith.select %84, %71, %85 : vector<32x2xi1>, vector<32x2xf32>
    %87 = arith.addf %80, %86 : vector<32x2xf32>
    %cst_33 = arith.constant 0.001953125 : f32
    %88 = vector.broadcast %cst_33 : f32 to vector<32x2xf32>
    %89 = arith.mulf %87, %88 : vector<32x2xf32>
    %90 = vector.extract_strided_slice %89 {offsets = [0, 0], sizes = [32, 1], strides = [1, 1]} : vector<32x2xf32> to vector<32x1xf32>
    %91 = vector.extract_strided_slice %89 {offsets = [0, 1], sizes = [32, 1], strides = [1, 1]} : vector<32x2xf32> to vector<32x1xf32>
    %92 = arith.mulf %90, %90 : vector<32x1xf32>
    %93 = arith.subf %91, %92 : vector<32x1xf32>
    %cst_34 = arith.constant 0.000000e+00 : f32
    %94 = vector.broadcast %cst_34 : f32 to vector<32x1xf32>
    %95 = arith.maximumf %93, %94 : vector<32x1xf32>
    %cst_35 = arith.constant 9.99999974E-6 : f32
    %96 = vector.broadcast %cst_35 : f32 to vector<32x1xf32>
    %97 = arith.addf %95, %96 : vector<32x1xf32>
    %98 = math.rsqrt %97 : vector<32x1xf32>
    %99 = arith.mulf %98, %2 : vector<32x1xf32>
    %100 = arith.mulf %90, %99 : vector<32x1xf32>
    %101 = arith.subf %3, %100 : vector<32x1xf32>
    %102 = vector.broadcast %99 : vector<32x1xf32> to vector<32x256xf32>
    %103 = arith.mulf %57, %102 : vector<32x256xf32>
    %104 = vector.broadcast %101 : vector<32x1xf32> to vector<32x256xf32>
    %105 = arith.addf %103, %104 : vector<32x256xf32>
    %cst_36 = arith.constant 0.000000e+00 : f32
    %cst_37 = arith.constant 6.000000e+00 : f32
    %106 = vector.broadcast %cst_36 : f32 to vector<32x256xf32>
    %107 = arith.maximumf %106, %105 : vector<32x256xf32>
    %108 = vector.broadcast %cst_37 : f32 to vector<32x256xf32>
    %109 = arith.minimumf %108, %107 : vector<32x256xf32>
    %cst_38 = arith.constant dense<0.000000e+00> : vector<32x256xf32>
    %110 = tpu.matmul %8, %109, %cst_38 {dimension_numbers = #tpu.dot_dimension_numbers<[1], [0], [0], [1], [0, 0, 1, 1], [], []>, precision = #tpu.contract_precision<fp32>} : vector<32x32xf32>, vector<32x256xf32>, vector<32x256xf32> -> vector<32x256xf32>
    %111 = vector.broadcast %4 : vector<32x1xf32> to vector<32x256xf32>
    %112 = arith.addf %110, %111 : vector<32x256xf32>
    %cst_39 = arith.constant dense<0.000000e+00> : vector<32xf32>
    %113 = vector.multi_reduction <add>, %112, %cst_39 [1] : vector<32x256xf32> to vector<32xf32>
    %114 = vector.shape_cast %113 : vector<32xf32> to vector<32x1xf32>
    %115 = arith.mulf %112, %112 : vector<32x256xf32>
    %cst_40 = arith.constant dense<0.000000e+00> : vector<32xf32>
    %116 = vector.multi_reduction <add>, %115, %cst_40 [1] : vector<32x256xf32> to vector<32xf32>
    %117 = vector.shape_cast %116 : vector<32xf32> to vector<32x1xf32>
    %c0_i32_41 = arith.constant 0 : i32
    %118 = vector.broadcast %c0_i32_41 : i32 to vector<32x2xi32>
    %119 = arith.cmpi eq, %12, %118 : vector<32x2xi32>
    %120 = vector.shape_cast %114 : vector<32x1xf32> to vector<32x1xf32>
    %121 = vector.broadcast %120 : vector<32x1xf32> to vector<32x2xf32>
    %122 = vector.shape_cast %117 : vector<32x1xf32> to vector<32x1xf32>
    %123 = vector.broadcast %122 : vector<32x1xf32> to vector<32x2xf32>
    %124 = arith.select %119, %121, %123 : vector<32x2xi1>, vector<32x2xf32>
    %c31_i32_42 = arith.constant 31 : i32
    %125 = tpu.dynamic_rotate %124 by %c31_i32_42 dim 0 : vector<32x2xf32>, i32 -> vector<32x2xf32>
    %c1_i32_43 = arith.constant 1 : i32
    %126 = tpu.dynamic_rotate %124 by %c1_i32_43 dim 0 : vector<32x2xf32>, i32 -> vector<32x2xf32>
    %cst_44 = arith.constant 1.000000e+00 : f32
    %127 = vector.broadcast %cst_44 : f32 to vector<32x1xf32>
    %128 = arith.addf %7, %127 : vector<32x1xf32>
    %cst_45 = arith.constant 2.000000e+00 : f32
    %129 = vector.broadcast %cst_45 : f32 to vector<32x1xf32>
    %130 = arith.cmpf olt, %128, %129 : vector<32x1xf32>
    %cst_46 = arith.constant 0.000000e+00 : f32
    %131 = vector.shape_cast %130 : vector<32x1xi1> to vector<32x1xi1>
    %132 = vector.broadcast %131 : vector<32x1xi1> to vector<32x2xi1>
    %133 = vector.broadcast %cst_46 : f32 to vector<32x2xf32>
    %134 = arith.select %132, %125, %133 : vector<32x2xi1>, vector<32x2xf32>
    %135 = arith.addf %124, %134 : vector<32x2xf32>
    %cst_47 = arith.constant 1.000000e+00 : f32
    %136 = vector.broadcast %cst_47 : f32 to vector<32x1xf32>
    %137 = arith.cmpf oge, %7, %136 : vector<32x1xf32>
    %cst_48 = arith.constant 0.000000e+00 : f32
    %138 = vector.shape_cast %137 : vector<32x1xi1> to vector<32x1xi1>
    %139 = vector.broadcast %138 : vector<32x1xi1> to vector<32x2xi1>
    %140 = vector.broadcast %cst_48 : f32 to vector<32x2xf32>
    %141 = arith.select %139, %126, %140 : vector<32x2xi1>, vector<32x2xf32>
    %142 = arith.addf %135, %141 : vector<32x2xf32>
    %cst_49 = arith.constant 0.001953125 : f32
    %143 = vector.broadcast %cst_49 : f32 to vector<32x2xf32>
    %144 = arith.mulf %142, %143 : vector<32x2xf32>
    %145 = vector.extract_strided_slice %144 {offsets = [0, 0], sizes = [32, 1], strides = [1, 1]} : vector<32x2xf32> to vector<32x1xf32>
    %146 = vector.extract_strided_slice %144 {offsets = [0, 1], sizes = [32, 1], strides = [1, 1]} : vector<32x2xf32> to vector<32x1xf32>
    %147 = arith.mulf %145, %145 : vector<32x1xf32>
    %148 = arith.subf %146, %147 : vector<32x1xf32>
    %cst_50 = arith.constant 0.000000e+00 : f32
    %149 = vector.broadcast %cst_50 : f32 to vector<32x1xf32>
    %150 = arith.maximumf %148, %149 : vector<32x1xf32>
    %cst_51 = arith.constant 9.99999974E-6 : f32
    %151 = vector.broadcast %cst_51 : f32 to vector<32x1xf32>
    %152 = arith.addf %150, %151 : vector<32x1xf32>
    %153 = math.rsqrt %152 : vector<32x1xf32>
    %154 = arith.mulf %153, %5 : vector<32x1xf32>
    %155 = arith.mulf %145, %154 : vector<32x1xf32>
    %156 = arith.subf %6, %155 : vector<32x1xf32>
    %157 = vector.broadcast %154 : vector<32x1xf32> to vector<32x256xf32>
    %158 = arith.mulf %112, %157 : vector<32x256xf32>
    %159 = vector.broadcast %156 : vector<32x1xf32> to vector<32x256xf32>
    %160 = arith.addf %158, %159 : vector<32x256xf32>
    %cst_52 = arith.constant 0.000000e+00 : f32
    %cst_53 = arith.constant 6.000000e+00 : f32
    %161 = vector.broadcast %cst_52 : f32 to vector<32x256xf32>
    %162 = arith.maximumf %161, %160 : vector<32x256xf32>
    %163 = vector.broadcast %cst_53 : f32 to vector<32x256xf32>
    %164 = arith.minimumf %163, %162 : vector<32x256xf32>
    %165 = vector.extract_strided_slice %164 {offsets = [0, 0], sizes = [16, 256], strides = [1, 1]} : vector<32x256xf32> to vector<16x256xf32>
    %c0_54 = arith.constant 0 : index
    %c0_55 = arith.constant 0 : index
    %166 = vector.load %arg6[%c0_54, %c0_55] : memref<16x256xf32, #tpu.memory_space<vmem>>, vector<16x256xf32>
    tpu.vector_store %arg6[%c0_54, %c0_55], %165 {strides = array<i32>} : memref<16x256xf32, #tpu.memory_space<vmem>>, vector<16x256xf32>,
    %167 = vector.extract_strided_slice %164 {offsets = [16, 0], sizes = [16, 256], strides = [1, 1]} : vector<32x256xf32> to vector<16x256xf32>
    %c0_56 = arith.constant 0 : index
    %c0_57 = arith.constant 0 : index
    %168 = vector.load %arg7[%c0_56, %c0_57] : memref<16x256xf32, #tpu.memory_space<vmem>>, vector<16x256xf32>
    tpu.vector_store %arg7[%c0_56, %c0_57], %167 {strides = array<i32>} : memref<16x256xf32, #tpu.memory_space<vmem>>, vector<16x256xf32>,
    return
  }
  func.func @transform_0(%arg0: i32) -> (i32, i32) {
    %c0_i32 = arith.constant 0 : i32
    %c0_i32_0 = arith.constant 0 : i32
    return %arg0, %c0_i32 : i32, i32
  }
  func.func @transform_1(%arg0: i32) -> (i32, i32) {
    %c0_i32 = arith.constant 0 : i32
    %c0_i32_0 = arith.constant 0 : i32
    return %arg0, %c0_i32 : i32, i32
  }
  func.func @transform_2(%arg0: i32) -> (i32, i32, i32) {
    %c0_i32 = arith.constant 0 : i32
    %c0_i32_0 = arith.constant 0 : i32
    %c0_i32_1 = arith.constant 0 : i32
    %c0_i32_2 = arith.constant 0 : i32
    return %c0_i32, %c0_i32_0, %c0_i32_1 : i32, i32, i32
  }
  func.func @transform_3(%arg0: i32) -> (i32, i32) {
    %c0_i32 = arith.constant 0 : i32
    %c0_i32_0 = arith.constant 0 : i32
    %c0_i32_1 = arith.constant 0 : i32
    return %c0_i32, %c0_i32_0 : i32, i32
  }
  func.func @transform_4(%arg0: i32) -> (i32, i32) {
    %c0_i32 = arith.constant 0 : i32
    %c0_i32_0 = arith.constant 0 : i32
    %c0_i32_1 = arith.constant 0 : i32
    return %c0_i32, %c0_i32_0 : i32, i32
  }
  func.func @transform_5(%arg0: i32) -> (i32, i32) {
    %c0_i32 = arith.constant 0 : i32
    %c0_i32_0 = arith.constant 0 : i32
    return %arg0, %c0_i32 : i32, i32
  }
  func.func @transform_6(%arg0: i32) -> (i32, i32) {
    %c0_i32 = arith.constant 0 : i32
    %c0_i32_0 = arith.constant 0 : i32
    return %arg0, %c0_i32 : i32, i32
  }
}

</mosaic_0001>

<bundles_post_ra>
// kernel: tile.19
= control target key start
LH: loop header
LB: loop body
LE: loop exit
PB: predicated region body
PF: predicated region fallthrough
CT: control target
= control target key end

     0   :  { %vm33_vm0 = vcmask 1045508   ;;  %s51_s18 = smov 48  ;;  %s62_s19 = smov 48  ;;  %vm35_vm1 = vcmask 64512   ;;  %vm46_vm2 = vcmask 261312   ;;  %vm57_vm3 = vcmask 195712   ;;  %s129_s0 = inlined_call_operand.vmem [shape: f32[4,8,6], index: 0, kind: input, shape index: {}]   ;;  %s130_s1 = inlined_call_operand.vmem [shape: f32[32,6], index: 1, kind: output, shape index: {}]  }
   0x1   :  { %v74_v0 = vld [vmem:[%s129_s0 + $0x14] sm:$0xf]  ;;  %v75_v1 = vld [vmem:[%s129_s0 + $0x10] sm:$0xf]  ;;  %v76_v2 = vld [vmem:[%s129_s0 + $0xc] sm:$0xf] }
   0x2   :  { %8 = vst [vmem:[#allocation0 + $0x28] sm:$0xf] %v74_v0  ;;  %13 = vst [vmem:[#allocation0 + $0x20] sm:$0xf] %v75_v1  ;;  %v77_v3 = vld [vmem:[%s129_s0 + $0x8] sm:$0xf] }
   0x3   :  { %18 = vst [vmem:[#allocation0 + $0x18] sm:$0xf] %v76_v2  ;;  %v78_v4 = vld [vmem:[%s129_s0 + $0x4] sm:$0xf]  ;;  %v28_v5 = vld [vmem:[%s129_s0] sm:$0xf] }
   0x4   :  { %23 = vst [vmem:[#allocation0 + $0x10] sm:$0xf] %v77_v3  ;;  %27 = vst [vmem:[#allocation0 + $0x8] sm:$0xf] %v78_v4  ;;  %s40_s0 = smov 48  ;;  %s31_s20 = smov 48 }
   0x5   :  { %29 = vst [vmem:[#allocation0] sm:$0xf] %v28_v5  ;;  %s82_s21 = smov 24   ;;  %s83_s22 = smov 8   ;;  %vm68_vm4 = vcmask 130112  }
   0x6   :  { %s84_s25 = smov 16  }
   0xc   :  { %v38_v6 = vld [vmem:[#allocation0 + $0x3] ss:$8 sm:$0xf]   ;;  %v49_v9 = vld [vmem:[#allocation0 + $0x2] ss:$8 sm:$0xf]  }
   0xd   :  { %v41_v7 = vld [vmem:[#allocation0 + $0x3] ss:$8 sm:%s40_s0]   ;;  %v52_v10 = vld [vmem:[#allocation0 + $0x2] ss:$8 sm:%s51_s18]   ;;  %v63_v12 = vld [vmem:[#allocation0 + $0x1] ss:$8 sm:%s62_s19]  }
   0xe   :  { %v43_v8 = vsel %vm33_vm0, %v41_v7, %v38_v6  ;;  %v60_v11 = vld [vmem:[#allocation0 + $0x1] ss:$8 sm:$0xf]   ;;  %v54_v13 = vsel %vm33_vm0, %v52_v10, %v49_v9  ;;  %v30_v15 = vld [vmem:[#allocation0] ss:$8 sm:$0xf]  }
   0xf   :  { %44 = vrot.lane.b32.xlu0 %v43_v8, %s82_s21  ;;  %v65_v14 = vsel %vm33_vm0, %v63_v12, %v60_v11  ;;  %v32_v16 = vld [vmem:[#allocation0] ss:$8 sm:%s31_s20]  }
  0x10   :  { %66 = vrot.lane.b32.xlu1 %v65_v14, %s83_s22  ;;  %v34_v17 = vsel %vm33_vm0, %v32_v16, %v30_v15 }
  0x11   :  { %36 = vst.msk [vmem:[%s130_s1] sm:$0x3f] %vm35_vm1, %v34_v17  }
  0x13   :  { %55 = vrot.lane.b32.xlu0 %v54_v13, %s84_s25 }
  0x81   :  { %v45_v18 = vpop.permute.xlu0 %44  }
  0x82   :  { %47 = vst.msk [vmem:[%s130_s1] sm:$0x3f] %vm46_vm2, %v45_v18   ;;  %v67_v19 = vpop.permute.xlu1 %66  }
  0x85   :  { %v56_v20 = vpop.permute.xlu0 %55  }
  0x86   :  { %58 = vst.msk [vmem:[%s130_s1] sm:$0x3f] %vm57_vm3, %v56_v20  }
  0x87   :  { %69 = vst.msk [vmem:[%s130_s1] sm:$0x3f] %vm68_vm4, %v67_v19  }

// kernel: _forward_impl.1
= control target key start
LH: loop header
LB: loop body
LE: loop exit
PB: predicated region body
PF: predicated region fallthrough
CT: control target
= control target key end

     0   :  { %v3214_v2 = vmov 0   ;;  %s1941_s25 = smov 17   ;;  %s1944_s14 = smov 1   ;;  %v1949_v31 = vmov 6   ;;  %v3213_v56 = vlaneseq  ;;  %s3206_s1 = inlined_call_operand.vmem [shape: f32[16,256], index: 1, kind: input, shape index: {}]   ;;  %s3207_s0 = inlined_call_operand.vmem [shape: f32[16,256], index: 0, kind: input, shape index: {}]   ;;  %s3208_s4 = inlined_call_operand.vmem [shape: f32[32,7], index: 4, kind: input, shape index: {}]   ;;  %s3209_s2 = inlined_call_operand.vmem [shape: f32[9,32,256], index: 2, kind: input, shape index: {}]   ;;  %s3210_s3 = inlined_call_operand.vmem [shape: f32[32,32], index: 3, kind: input, shape index: {}]   ;;  %s3211_s5 = inlined_call_operand.vmem [shape: f32[16,256], index: 5, kind: output, shape index: {0}]   ;;  %s3212_s6 = inlined_call_operand.vmem [shape: f32[16,256], index: 6, kind: output, shape index: {1}]  }
   0x1   :  { %v1996_v0 = vld [vmem:[%s3206_s1] sm:$0xff]  ;;  %1907 = vset.pattern.permute.xlu1 %v3214_v2  ;;  %1906 = vset.pattern.permute.xlu0 %v3214_v2  ;;  %v2010_v3 = vld [vmem:[%s3207_s0 + $0x8] sm:$0xff]  ;;  %v2015_v4 = vld [vmem:[%s3207_s0 + $0x10] sm:$0xff]  ;;  %s1945_s15 = smov 127   ;;  %s1946_s16 = smov 113  }
   0x2   :  { %v2001_v1 = vld [vmem:[%s3207_s0] sm:$0xff]  ;;  %61 = vrot.lane.b32.xlu1 %v1996_v0, %s1941_s25  ;;  %v2022_v5 = vld [vmem:[%s3206_s1 + $0x8] sm:$0xff]  ;;  %v2027_v6 = vld [vmem:[%s3207_s0 + $0x18] sm:$0xff]  ;;  %s1942_s0 = smov 16   ;;  %s1947_s17 = smov 112   ;;  %v2224_v57 = vand.u32 127, %v3213_v56 }
   0x3   :  { %57 = vrot.lane.b32.xlu0 %v2001_v1, %s1941_s25  ;;  %v2034_v7 = vld [vmem:[%s3206_s1 + $0x18] sm:$0xff]  ;;  %v2039_v8 = vld [vmem:[%s3206_s1 + $0x10] sm:$0xff]  ;;  %s1943_s1 = smov 15   ;;  %v2108_v9 = vld [vmem:[%s3208_s4 + $0x8] sm:$0xff]  ;;  %s1948_s24 = smov 111  }
   0x4   :  { %3238 = vst [vmem:[#allocation2_spill] sm:$0xff] %v2108_v9  ;;  %v2113_v10 = vld [vmem:[%s3208_s4] sm:$0xff]  ;;  %v2120_v11 = vld [vmem:[%s3208_s4 + $0x10] sm:$0xff]  ;;  %v2144_v18 = vld [vmem:[%s3208_s4 + $0x18] sm:$0xff]  ;;  %vm73_vm0 = vcmp.lt.s32.totalorder %v2224_v57, 17  ;;  %vm122_vm1 = vcmp.lt.s32.totalorder %v2224_v57, 16 }
   0x5   :  { %3239 = vst [vmem:[#allocation3_spill] sm:$0xff] %v2113_v10  ;;  %3240 = vst [vmem:[#allocation4_spill] sm:$0xff] %v2120_v11  ;;  %v1728_v60 = vld [vmem:[%s3209_s2 + $0x100] sm:$0xff]  ;;  %v1729_v61 = vld [vmem:[%s3209_s2 + $0x108] sm:$0xff]  ;;  %vm172_vm2 = vcmp.lt.s32.totalorder %v2224_v57, 15  ;;  %vm222_vm3 = vcmp.lt.s32.totalorder %v2224_v57, 1 }
   0x6   :  { %65 = vrot.lane.b32.xlu1 %v2010_v3, %s1941_s25  ;;  %3241 = vst [vmem:[#allocation5_spill] sm:$0xff] %v2144_v18  ;;  %v82_v62 = vld [vmem:[%s3209_s2] sm:$0xff]  ;;  %v83_v56 = vld [vmem:[%s3209_s2 + $0x8] sm:$0xff]  ;;  %vm272_vm4 = vcmp.lt.s32.totalorder %v2224_v57, 127  ;;  %vm322_vm5 = vcmp.lt.s32.totalorder %v2224_v57, 113  ;;  %vm372_vm6 = vcmp.lt.s32.totalorder %v2224_v57, 112 }
   0x7   :  { %59 = vrot.lane.b32.xlu0 %v2015_v4, %s1941_s25  ;;  %vm422_vm7 = vcmp.lt.s32.totalorder %v2224_v57, 111  ;;  %s1951_s10 = smov 2  }
   0xa   :  { %69 = vrot.lane.b32.xlu1 %v2022_v5, %s1941_s25 }
   0xb   :  { %67 = vrot.lane.b32.xlu0 %v2027_v6, %s1941_s25 }
   0xe   :  { %71 = vrot.lane.b32.xlu1 %v2034_v7, %s1941_s25 }
   0xf   :  { %63 = vrot.lane.b32.xlu0 %v2039_v8, %s1941_s25 }
  0x12   :  { %108 = vrot.lane.b32.xlu1 %v2015_v4, %s1942_s0 }
  0x13   :  { %106 = vrot.lane.b32.xlu0 %v2001_v1, %s1942_s0 }
  0x16   :  { %114 = vrot.lane.b32.xlu1 %v2010_v3, %s1942_s0 }
  0x17   :  { %110 = vrot.lane.b32.xlu0 %v1996_v0, %s1942_s0 }
  0x1a   :  { %118 = vrot.lane.b32.xlu1 %v2022_v5, %s1942_s0 }
  0x1b   :  { %116 = vrot.lane.b32.xlu0 %v2027_v6, %s1942_s0 }
  0x1e   :  { %120 = vrot.lane.b32.xlu1 %v2034_v7, %s1942_s0 }
  0x1f   :  { %112 = vrot.lane.b32.xlu0 %v2039_v8, %s1942_s0 }
  0x22   :  { %158 = vrot.lane.b32.xlu1 %v2015_v4, %s1943_s1 }
  0x23   :  { %156 = vrot.lane.b32.xlu0 %v2001_v1, %s1943_s1 }
  0x26   :  { %164 = vrot.lane.b32.xlu1 %v2010_v3, %s1943_s1 }
  0x27   :  { %160 = vrot.lane.b32.xlu0 %v1996_v0, %s1943_s1 }
  0x2a   :  { %168 = vrot.lane.b32.xlu1 %v2022_v5, %s1943_s1 }
  0x2b   :  { %166 = vrot.lane.b32.xlu0 %v2027_v6, %s1943_s1 }
  0x2e   :  { %170 = vrot.lane.b32.xlu1 %v2034_v7, %s1943_s1 }
  0x2f   :  { %162 = vrot.lane.b32.xlu0 %v2039_v8, %s1943_s1 }
  0x32   :  { %208 = vrot.lane.b32.xlu1 %v2015_v4, %s1944_s14 }
  0x33   :  { %206 = vrot.lane.b32.xlu0 %v2001_v1, %s1944_s14 }
  0x36   :  { %214 = vrot.lane.b32.xlu1 %v2010_v3, %s1944_s14 }
  0x37   :  { %210 = vrot.lane.b32.xlu0 %v1996_v0, %s1944_s14 }
  0x3a   :  { %218 = vrot.lane.b32.xlu1 %v2022_v5, %s1944_s14 }
  0x3b   :  { %216 = vrot.lane.b32.xlu0 %v2027_v6, %s1944_s14 }
  0x3e   :  { %220 = vrot.lane.b32.xlu1 %v2034_v7, %s1944_s14 }
  0x3f   :  { %212 = vrot.lane.b32.xlu0 %v2039_v8, %s1944_s14 }
  0x42   :  { %258 = vrot.lane.b32.xlu1 %v2015_v4, %s1945_s15 }
  0x43   :  { %256 = vrot.lane.b32.xlu0 %v2001_v1, %s1945_s15 }
  0x46   :  { %264 = vrot.lane.b32.xlu1 %v2010_v3, %s1945_s15 }
  0x47   :  { %260 = vrot.lane.b32.xlu0 %v1996_v0, %s1945_s15 }
  0x4a   :  { %268 = vrot.lane.b32.xlu1 %v2022_v5, %s1945_s15 }
  0x4b   :  { %266 = vrot.lane.b32.xlu0 %v2027_v6, %s1945_s15 }
  0x4e   :  { %270 = vrot.lane.b32.xlu1 %v2034_v7, %s1945_s15 }
  0x4f   :  { %262 = vrot.lane.b32.xlu0 %v2039_v8, %s1945_s15 }
  0x52   :  { %308 = vrot.lane.b32.xlu1 %v2015_v4, %s1946_s16 }
  0x53   :  { %306 = vrot.lane.b32.xlu0 %v2001_v1, %s1946_s16 }
  0x56   :  { %314 = vrot.lane.b32.xlu1 %v2010_v3, %s1946_s16 }
  0x57   :  { %310 = vrot.lane.b32.xlu0 %v1996_v0, %s1946_s16 }
  0x5a   :  { %318 = vrot.lane.b32.xlu1 %v2022_v5, %s1946_s16 }
  0x5b   :  { %316 = vrot.lane.b32.xlu0 %v2027_v6, %s1946_s16 }
  0x5e   :  { %320 = vrot.lane.b32.xlu1 %v2034_v7, %s1946_s16 }
  0x5f   :  { %312 = vrot.lane.b32.xlu0 %v2039_v8, %s1946_s16 }
  0x62   :  { %358 = vrot.lane.b32.xlu1 %v2015_v4, %s1947_s17 }
  0x63   :  { %356 = vrot.lane.b32.xlu0 %v2001_v1, %s1947_s17 }
  0x66   :  { %364 = vrot.lane.b32.xlu1 %v2010_v3, %s1947_s17 }
  0x67   :  { %360 = vrot.lane.b32.xlu0 %v1996_v0, %s1947_s17 }
  0x6a   :  { %368 = vrot.lane.b32.xlu1 %v2022_v5, %s1947_s17 }
  0x6b   :  { %366 = vrot.lane.b32.xlu0 %v2027_v6, %s1947_s17 }
  0x6e   :  { %463 = vperm.xlu1 %1907, %v2108_v9   ;;  %v86_v9 = vld [vmem:[%s3209_s2 + $0x20] sm:$0xff] }
  0x6f   :  { %458 = vperm.xlu0 %1906, %v2113_v10   ;;  %v1733_v10 = vld [vmem:[%s3209_s2 + $0x128] sm:$0xff] }
  0x72   :  { %468 = vperm.xlu1 %1907, %v2120_v11   ;;  %v1732_v11 = vld [vmem:[%s3209_s2 + $0x120] sm:$0xff] }
  0x73   :  { %362 = vrot.lane.b32.xlu0 %v2039_v8, %s1947_s17 }
  0x74   :  { %v2124_v12 = vpop.permute.xlu1 %61 }
  0x75   :  { %v2126_v13 = vpop.permute.xlu0 %57 }
  0x76   :  { %370 = vrot.lane.b32.xlu1 %v2034_v7, %s1947_s17 }
  0x77   :  { %406 = vrot.lane.b32.xlu0 %v2001_v1, %s1948_s24  ;;  %1909 = vset.pattern.permute.xlu1 %v1949_v31 }
  0x78   :  { %v2130_v14 = vpop.permute.xlu1 %65 }
  0x79   :  { %v2132_v15 = vpop.permute.xlu0 %59  ;;  %v74_v2 = vsel %vm73_vm0, %v2126_v13, %v2130_v14 }
  0x7a   :  { %408 = vrot.lane.b32.xlu1 %v2015_v4, %s1948_s24 }
  0x7b   :  { %410 = vrot.lane.b32.xlu0 %v1996_v0, %s1948_s24 }
  0x7c   :  { %v2136_v16 = vpop.permute.xlu1 %69 }
  0x7d   :  { %v2138_v17 = vpop.permute.xlu0 %67 }
  0x7e   :  { %414 = vrot.lane.b32.xlu1 %v2010_v3, %s1948_s24 }
  0x7f   :  { %416 = vrot.lane.b32.xlu0 %v2027_v6, %s1948_s24 }
  0x80   :  { %v2147_v19 = vpop.permute.xlu1 %71 }
  0x81   :  { %v2149_v20 = vpop.permute.xlu0 %63 }
  0x82   :  { %418 = vrot.lane.b32.xlu1 %v2022_v5, %s1948_s24 }
  0x83   :  { %473 = vperm.xlu0 %1906, %v2144_v18   ;;  %v78_v18 = vsel %vm73_vm0, %v2130_v14, %v2126_v13  ;;  %v76_v13 = vsel %vm73_vm0, %v2124_v12, %v2136_v16  ;;  %v80_v14 = vsel %vm73_vm0, %v2136_v16, %v2124_v12  ;;  %v75_v12 = vsel %vm73_vm0, %v2132_v15, %v2138_v17 }
  0x84   :  { %v2153_v21 = vpop.permute.xlu1 %108  ;;  %v79_v16 = vsel %vm73_vm0, %v2138_v17, %v2132_v15  ;;  %v54_v15 = vmul.f32 %v1733_v10, %v2022_v5  ;;  %v94_v17 = vmul.f32 %v86_v9, %v80_v14  ;;  %v77_v9 = vsel %vm73_vm0, %v2149_v20, %v2147_v19 }
  0x85   :  { %v2155_v22 = vpop.permute.xlu0 %106 }
  0x86   :  { %412 = vrot.lane.b32.xlu1 %v2039_v8, %s1948_s24 }
  0x87   :  { %420 = vrot.lane.b32.xlu0 %v2034_v7, %s1948_s24 }
  0x88   :  { %v2159_v23 = vpop.permute.xlu1 %114  ;;  %1908 = vset.pattern.permute.xlu0 %v1949_v31 }
  0x89   :  { %v2161_v24 = vpop.permute.xlu0 %110 }
  0x8c   :  { %v2163_v25 = vpop.permute.xlu1 %118 }
  0x8d   :  { %v2165_v26 = vpop.permute.xlu0 %116 }
  0x90   :  { %v2167_v27 = vpop.permute.xlu1 %120 }
  0x91   :  { %v2169_v28 = vpop.permute.xlu0 %112 }
  0x94   :  { %v2171_v29 = vpop.permute.xlu1 %158 }
  0x95   :  { %v2173_v30 = vpop.permute.xlu0 %156 }
  0x98   :  { %v2175_v32 = vpop.permute.xlu1 %164 }
  0x99   :  { %v2177_v33 = vpop.permute.xlu0 %160 }
  0x9c   :  { %v2179_v34 = vpop.permute.xlu1 %168 }
  0x9d   :  { %v2181_v35 = vpop.permute.xlu0 %166 }
  0xa0   :  { %v2183_v36 = vpop.permute.xlu1 %170 }
  0xa1   :  { %v2185_v37 = vpop.permute.xlu0 %162 }
  0xa4   :  { %v2187_v38 = vpop.permute.xlu1 %208 }
  0xa5   :  { %v2189_v39 = vpop.permute.xlu0 %206 }
  0xa8   :  { %v2191_v40 = vpop.permute.xlu1 %214 }
  0xa9   :  { %v2193_v41 = vpop.permute.xlu0 %210 }
  0xac   :  { %v2195_v42 = vpop.permute.xlu1 %218 }
  0xad   :  { %v2197_v43 = vpop.permute.xlu0 %216 }
  0xb0   :  { %v2199_v44 = vpop.permute.xlu1 %220 }
  0xb1   :  { %v2201_v45 = vpop.permute.xlu0 %212 }
  0xb4   :  { %v2203_v46 = vpop.permute.xlu1 %258 }
  0xb5   :  { %3242 = vst [vmem:[#allocation6_spill] sm:$0xff] %v2203_v46  ;;  %v2205_v47 = vpop.permute.xlu0 %256  ;;  %v91_v46 = vmul.f32 %v83_v56, %v74_v2 }
  0xb6   :  { %3243 = vst [vmem:[#allocation7_spill] sm:$0xff] %v2205_v47 }
  0xb8   :  { %v2207_v48 = vpop.permute.xlu1 %264 }
  0xb9   :  { %v2209_v49 = vpop.permute.xlu0 %260 }
  0xba   :  { %3244 = vst [vmem:[#allocation8_spill] sm:$0xff] %v2209_v49  ;;  %v1735_v49 = vld [vmem:[%s3209_s2 + $0x138] sm:$0xff] }
  0xbc   :  { %v2211_v50 = vpop.permute.xlu1 %268 }
  0xbd   :  { %3245 = vst [vmem:[#allocation9_spill] sm:$0xff] %v2211_v50  ;;  %v2213_v51 = vpop.permute.xlu0 %266  ;;  %v53_v50 = vmul.f32 %v1732_v11, %v1996_v0  ;;  %v1736_v11 = vld [vmem:[%s3209_s2 + $0x40] sm:$0xff] }
  0xbe   :  { %3246 = vst [vmem:[#allocation10_spill] sm:$0xff] %v2213_v51  ;;  %v1734_v51 = vld [vmem:[%s3209_s2 + $0x130] sm:$0xff] }
  0xc0   :  { %v2215_v52 = vpop.permute.xlu1 %270 }
  0xc1   :  { %3247 = vst [vmem:[#allocation11_spill] sm:$0xff] %v2215_v52  ;;  %v2217_v53 = vpop.permute.xlu0 %262  ;;  %v90_v52 = vmul.f32 %v82_v62, %v78_v18  ;;  %v56_v62 = vmul.f32 %v1735_v49, %v2034_v7  ;;  %v81_v7 = vsel %vm73_vm0, %v2147_v19, %v2149_v20  ;;  %v123_v49 = vsel %vm122_vm1, %v2155_v22, %v2159_v23 }
  0xc2   :  { %3248 = vst [vmem:[#allocation12_spill] sm:$0xff] %v2217_v53  ;;  %v50_v53 = vmul.f32 %v1729_v61, %v2010_v3  ;;  %v55_v61 = vmul.f32 %v1734_v51, %v2039_v8  ;;  %v102_v8 = vadd.f32 %v94_v17, %v53_v50  ;;  %v127_v19 = vsel %vm122_vm1, %v2159_v23, %v2155_v22  ;;  %v1740_v50 = vld [vmem:[%s3209_s2 + $0x60] sm:$0xff]  ;;  %v1741_v51 = vld [vmem:[%s3209_s2 + $0x68] sm:$0xff] }
  0xc3   :  { %v129_v22 = vsel %vm122_vm1, %v2163_v25, %v2161_v24  ;;  %v1745_v17 = vld [vmem:[%s3209_s2 + $0x88] sm:$0xff]  ;;  %vm516_vm0 = vcmp.eq.s32.totalorder %v2224_v57, 0 }
  0xc4   :  { %v2219_v54 = vpop.permute.xlu1 %308  ;;  %v99_v5 = vadd.f32 %v91_v46, %v50_v53  ;;  %v1737_v46 = vld [vmem:[%s3209_s2 + $0x48] sm:$0xff] }
  0xc5   :  { %3249 = vst [vmem:[#allocation13_spill] sm:$0xff] %v2219_v54  ;;  %v2221_v55 = vpop.permute.xlu0 %306  ;;  %v87_v54 = vld [vmem:[%s3209_s2 + $0x28] sm:$0xff] }
  0xc6   :  { %3250 = vst [vmem:[#allocation14_spill] sm:$0xff] %v2221_v55  ;;  %v85_v55 = vld [vmem:[%s3209_s2 + $0x18] sm:$0xff]  ;;  %v95_v47 = vmul.f32 %v87_v54, %v76_v13  ;;  %v1738_v54 = vld [vmem:[%s3209_s2 + $0x50] sm:$0xff]  ;;  %v126_v13 = vsel %vm122_vm1, %v2169_v28, %v2167_v27 }
  0xc7   :  { %v93_v2 = vmul.f32 %v85_v55, %v75_v12  ;;  %v1739_v55 = vld [vmem:[%s3209_s2 + $0x58] sm:$0xff]  ;;  %v144_v12 = vmul.f32 %v1740_v50, %v129_v22 }
  0xc8   :  { %v2226_v58 = vpop.permute.xlu1 %314  ;;  %v103_v10 = vadd.f32 %v95_v47, %v54_v15  ;;  %v1744_v15 = vld [vmem:[%s3209_s2 + $0x80] sm:$0xff] }
  0xc9   :  { %3251 = vst [vmem:[#allocation15_spill] sm:$0xff] %v2226_v58  ;;  %v2228_v59 = vpop.permute.xlu0 %310  ;;  %v49_v58 = vmul.f32 %v1728_v60, %v2001_v1 }
  0xca   :  { %3252 = vst [vmem:[#allocation16_spill] sm:$0xff] %v2228_v59  ;;  %v1731_v59 = vld [vmem:[%s3209_s2 + $0x118] sm:$0xff] }
  0xcb   :  { %v52_v3 = vmul.f32 %v1731_v59, %v2027_v6  ;;  %v98_v0 = vadd.f32 %v90_v52, %v49_v58  ;;  %v89_v6 = vld [vmem:[%s3209_s2 + $0x38] sm:$0xff]  ;;  %v125_v52 = vsel %vm122_vm1, %v2161_v24, %v2163_v25  ;;  %v124_v58 = vsel %vm122_vm1, %v2153_v21, %v2165_v26 }
  0xcc   :  { %v2240_v63 = vpop.permute.xlu1 %318  ;;  %v97_v53 = vmul.f32 %v89_v6, %v77_v9  ;;  %v128_v24 = vsel %vm122_vm1, %v2165_v26, %v2153_v21  ;;  %v140_v25 = vmul.f32 %v1736_v11, %v127_v19  ;;  %v141_v59 = vmul.f32 %v1737_v46, %v123_v49  ;;  %v1746_v9 = vld [vmem:[%s3209_s2 + $0x90] sm:$0xff] }
  0xcd   :  { %3253 = vst [vmem:[#allocation17_spill] sm:$0xff] %v2240_v63  ;;  %v2242_v31 = vpop.permute.xlu0 %316  ;;  %v84_v63 = vld [vmem:[%s3209_s2 + $0x10] sm:$0xff]  ;;  %v101_v47 = vadd.f32 %v93_v2, %v52_v3  ;;  %v130_v21 = vsel %vm122_vm1, %v2167_v27, %v2169_v28  ;;  %v177_v27 = vsel %vm172_vm2, %v2175_v32, %v2173_v30  ;;  %v142_v28 = vmul.f32 %v1738_v54, %v128_v24  ;;  %v1749_v2 = vld [vmem:[%s3209_s2 + $0xa8] sm:$0xff] }
  0xce   :  { %3254 = vst [vmem:[#allocation18_spill] sm:$0xff] %v2242_v31  ;;  %v1730_v31 = vld [vmem:[%s3209_s2 + $0x110] sm:$0xff]  ;;  %v92_v18 = vmul.f32 %v84_v63, %v79_v16  ;;  %v145_v16 = vmul.f32 %v1741_v51, %v125_v52  ;;  %v143_v3 = vmul.f32 %v1739_v55, %v124_v58  ;;  %v174_v11 = vsel %vm172_vm2, %v2171_v29, %v2181_v35 }
  0xcf   :  { %v51_v1 = vmul.f32 %v1730_v31, %v2015_v4  ;;  %v88_v4 = vld [vmem:[%s3209_s2 + $0x30] sm:$0xff]  ;;  %v1743_v31 = vld [vmem:[%s3209_s2 + $0x78] sm:$0xff]  ;;  %v105_v46 = vadd.f32 %v97_v53, %v56_v62  ;;  %v190_v49 = vmul.f32 %v1744_v15, %v177_v27  ;;  %v148_v50 = vadd.f32 %v140_v25, %v98_v0 }
  0xd0   :  { %v2308_v56 = vpop.permute.xlu1 %320  ;;  %v96_v23 = vmul.f32 %v88_v4, %v81_v7  ;;  %v1742_v63 = vld [vmem:[%s3209_s2 + $0x70] sm:$0xff]  ;;  %v175_v4 = vsel %vm172_vm2, %v2177_v33, %v2179_v34  ;;  %v147_v6 = vmul.f32 %v1743_v31, %v126_v13  ;;  %v1747_v7 = vld [vmem:[%s3209_s2 + $0x98] sm:$0xff]  ;;  %v149_v51 = vadd.f32 %v141_v59, %v99_v5  ;;  %v1756_v59 = vld [vmem:[%s3209_s2 + $0xe0] sm:$0xff] }
  0xd1   :  { %v2310_v60 = vpop.permute.xlu0 %312  ;;  %v100_v20 = vadd.f32 %v92_v18, %v51_v1  ;;  %v173_v1 = vsel %vm172_vm2, %v2173_v30, %v2175_v32  ;;  %v1748_v18 = vld [vmem:[%s3209_s2 + $0xa0] sm:$0xff]  ;;  %v179_v30 = vsel %vm172_vm2, %v2179_v34, %v2177_v33  ;;  %v146_v32 = vmul.f32 %v1742_v63, %v130_v21  ;;  %v1750_v62 = vld [vmem:[%s3209_s2 + $0xb0] sm:$0xff]  ;;  %v1751_v0 = vld [vmem:[%s3209_s2 + $0xb8] sm:$0xff] }
  0xd2   :  { %3255 = vst [vmem:[#allocation19_spill] sm:$0xff] %v2310_v60  ;;  %v178_v33 = vsel %vm172_vm2, %v2181_v35, %v2171_v29  ;;  %v104_v34 = vadd.f32 %v96_v23, %v55_v61  ;;  %v191_v19 = vmul.f32 %v1745_v17, %v173_v1  ;;  %v194_v52 = vmul.f32 %v1748_v18, %v179_v30  ;;  %v1753_v23 = vld [vmem:[%s3209_s2 + $0xc8] sm:$0xff]  ;;  %v1754_v17 = vld [vmem:[%s3209_s2 + $0xd0] sm:$0xff]  ;;  %v1755_v1 = vld [vmem:[%s3209_s2 + $0xd8] sm:$0xff] }
  0xd3   :  { %v195_v22 = vmul.f32 %v1749_v2, %v175_v4  ;;  %v152_v54 = vadd.f32 %v144_v12, %v102_v8  ;;  %v153_v55 = vadd.f32 %v145_v16, %v103_v10  ;;  %v192_v58 = vmul.f32 %v1746_v9, %v178_v33  ;;  %v1757_v12 = vld [vmem:[%s3209_s2 + $0xe8] sm:$0xff]  ;;  %v1759_v18 = vld [vmem:[%s3209_s2 + $0xf8] sm:$0xff] }
  0xd4   :  { %v2386_v26 = vpop.permute.xlu1 %358  ;;  %v193_v24 = vmul.f32 %v1747_v7, %v174_v11  ;;  %v150_v13 = vadd.f32 %v142_v28, %v100_v20  ;;  %v151_v21 = vadd.f32 %v143_v3, %v101_v47  ;;  %v154_v60 = vadd.f32 %v146_v32, %v104_v34  ;;  %v1752_v47 = vld [vmem:[%s3209_s2 + $0xc0] sm:$0xff]  ;;  %v1758_v3 = vld [vmem:[%s3209_s2 + $0xf0] sm:$0xff]  ;;  %v1761_v9 = vld [vmem:[%s3209_s2 + $0x148] sm:$0xff] }
  0xd5   :  { %v2388_v14 = vpop.permute.xlu0 %356  ;;  %v155_v29 = vadd.f32 %v147_v6, %v105_v46  ;;  %v198_v35 = vadd.f32 %v190_v49, %v148_v50  ;;  %v199_v61 = vadd.f32 %v191_v19, %v149_v51  ;;  %v176_v5 = vsel %vm172_vm2, %v2185_v37, %v2183_v36  ;;  %v1760_v6 = vld [vmem:[%s3209_s2 + $0x140] sm:$0xff]  ;;  %v3256_v7 = vld [vmem:[#allocation7_spill] sm:$0xff]  ;;  %v3257_v49 = vld [vmem:[#allocation9_spill] sm:$0xff] }
  0xd6   :  { %v180_v8 = vsel %vm172_vm2, %v2183_v36, %v2185_v37  ;;  %v202_v10 = vadd.f32 %v194_v52, %v152_v54  ;;  %v203_v20 = vadd.f32 %v195_v22, %v153_v55  ;;  %v223_v53 = vsel %vm222_vm3, %v2189_v39, %v2191_v40  ;;  %v1764_v34 = vld [vmem:[%s3209_s2 + $0x160] sm:$0xff]  ;;  %v1765_v46 = vld [vmem:[%s3209_s2 + $0x168] sm:$0xff]  ;;  %v3258_v19 = vld [vmem:[#allocation8_spill] sm:$0xff] }
  0xd7   :  { %v227_v36 = vsel %vm222_vm3, %v2191_v40, %v2189_v39  ;;  %v200_v37 = vadd.f32 %v192_v58, %v150_v13  ;;  %v201_v25 = vadd.f32 %v193_v24, %v151_v21  ;;  %v225_v16 = vsel %vm222_vm3, %v2193_v41, %v2195_v42  ;;  %v1762_v24 = vld [vmem:[%s3209_s2 + $0x150] sm:$0xff]  ;;  %v1763_v13 = vld [vmem:[%s3209_s2 + $0x158] sm:$0xff]  ;;  %v3259_v21 = vld [vmem:[#allocation10_spill] sm:$0xff] }
  0xd8   :  { %v2433_v63 = vpop.permute.xlu1 %364  ;;  %v229_v39 = vsel %vm222_vm3, %v2195_v42, %v2193_v41  ;;  %v196_v40 = vmul.f32 %v1750_v62, %v180_v8  ;;  %v197_v15 = vmul.f32 %v1751_v0, %v176_v5  ;;  %v224_v27 = vsel %vm222_vm3, %v2187_v38, %v2197_v43  ;;  %v3260_v62 = vld [vmem:[#allocation6_spill] sm:$0xff] }
  0xd9   :  { %v2435_v31 = vpop.permute.xlu0 %360  ;;  %v228_v41 = vsel %vm222_vm3, %v2197_v43, %v2187_v38  ;;  %v240_v42 = vmul.f32 %v1752_v47, %v227_v36  ;;  %v241_v28 = vmul.f32 %v1753_v23, %v223_v53  ;;  %v226_v2 = vsel %vm222_vm3, %v2201_v45, %v2199_v44 }
  0xda   :  { %v230_v38 = vsel %vm222_vm3, %v2199_v44, %v2201_v45  ;;  %v244_v30 = vmul.f32 %v1756_v59, %v229_v39  ;;  %v245_v32 = vmul.f32 %v1757_v12, %v225_v16  ;;  %v273_v11 = vsel %vm272_vm4, %v3256_v7, %v2207_v48 }
  0xdb   :  { %v277_v44 = vsel %vm272_vm4, %v2207_v48, %v3256_v7  ;;  %v242_v45 = vmul.f32 %v1754_v17, %v228_v41  ;;  %v243_v33 = vmul.f32 %v1755_v1, %v224_v27  ;;  %v275_v50 = vsel %vm272_vm4, %v3258_v19, %v3257_v49  ;;  %v1767_v17 = vld [vmem:[%s3209_s2 + $0x178] sm:$0xff]  ;;  %v3261_v1 = vld [vmem:[#allocation11_spill] sm:$0xff]  ;;  %v3262_v27 = vld [vmem:[#allocation12_spill] sm:$0xff] }
  0xdc   :  { %v2508_v43 = vpop.permute.xlu1 %368  ;;  %v279_v48 = vsel %vm272_vm4, %v3257_v49, %v3258_v19  ;;  %v204_v51 = vadd.f32 %v196_v40, %v154_v60  ;;  %v205_v52 = vadd.f32 %v197_v15, %v155_v29  ;;  %v246_v22 = vmul.f32 %v1758_v3, %v230_v38  ;;  %v1766_v15 = vld [vmem:[%s3209_s2 + $0x170] sm:$0xff]  ;;  %v3263_v38 = vld [vmem:[#allocation15_spill] sm:$0xff] }
  0xdd   :  { %v2510_v4 = vpop.permute.xlu0 %366  ;;  %v247_v54 = vmul.f32 %v1759_v18, %v226_v2  ;;  %v290_v55 = vmul.f32 %v1760_v6, %v273_v11  ;;  %v291_v58 = vmul.f32 %v1761_v9, %v277_v44  ;;  %v274_v0 = vsel %vm272_vm4, %v3260_v62, %v3259_v21  ;;  %v1768_v18 = vld [vmem:[%s3209_s2 + $0x180] sm:$0xff]  ;;  %v1769_v2 = vld [vmem:[%s3209_s2 + $0x188] sm:$0xff] }
  0xde   :  { %v278_v60 = vsel %vm272_vm4, %v3259_v21, %v3260_v62  ;;  %v248_v8 = vadd.f32 %v240_v42, %v198_v35  ;;  %v249_v47 = vadd.f32 %v241_v28, %v199_v61  ;;  %v294_v23 = vmul.f32 %v1764_v34, %v275_v50  ;;  %v1772_v11 = vld [vmem:[%s3209_s2 + $0x1a0] sm:$0xff]  ;;  %v1773_v44 = vld [vmem:[%s3209_s2 + $0x1a8] sm:$0xff]  ;;  %v1770_v50 = vld [vmem:[%s3209_s2 + $0x190] sm:$0xff] }
  0xdf   :  { %v295_v53 = vmul.f32 %v1765_v46, %v279_v48  ;;  %v252_v36 = vadd.f32 %v244_v30, %v202_v10  ;;  %v253_v59 = vadd.f32 %v245_v32, %v203_v20  ;;  %v250_v12 = vadd.f32 %v242_v45, %v200_v37  ;;  %v3264_v30 = vld [vmem:[#allocation14_spill] sm:$0xff]  ;;  %v3265_v45 = vld [vmem:[#allocation17_spill] sm:$0xff] }
  0xe0   :  { %v251_v16 = vadd.f32 %v243_v33, %v201_v25  ;;  %v292_v39 = vmul.f32 %v1762_v24, %v274_v0  ;;  %v293_v40 = vmul.f32 %v1763_v13, %v278_v60  ;;  %v276_v35 = vsel %vm272_vm4, %v3262_v27, %v3261_v1  ;;  %v3266_v33 = vld [vmem:[#allocation16_spill] sm:$0xff]  ;;  %v1771_v48 = vld [vmem:[%s3209_s2 + $0x198] sm:$0xff]  ;;  %v1776_v24 = vld [vmem:[%s3209_s2 + $0x1c0] sm:$0xff] }
  0xe1   :  { %v280_v61 = vsel %vm272_vm4, %v3261_v1, %v3262_v27  ;;  %v254_v10 = vadd.f32 %v246_v22, %v204_v51  ;;  %v255_v20 = vadd.f32 %v247_v54, %v205_v52  ;;  %v298_v37 = vadd.f32 %v290_v55, %v248_v8  ;;  %v3267_v51 = vld [vmem:[#allocation18_spill] sm:$0xff]  ;;  %v3268_v52 = vld [vmem:[#allocation13_spill] sm:$0xff]  ;;  %v1777_v13 = vld [vmem:[%s3209_s2 + $0x1c8] sm:$0xff] }
  0xe2   :  { %v299_v25 = vadd.f32 %v291_v58, %v249_v47  ;;  %v302_v28 = vadd.f32 %v294_v23, %v252_v36  ;;  %v303_v3 = vadd.f32 %v295_v53, %v253_v59  ;;  %v323_v32 = vsel %vm322_vm5, %v3264_v30, %v3263_v38  ;;  %v1778_v23 = vld [vmem:[%s3209_s2 + $0x1d0] sm:$0xff]  ;;  %v1779_v53 = vld [vmem:[%s3209_s2 + $0x1d8] sm:$0xff]  ;;  %v1780_v27 = vld [vmem:[%s3209_s2 + $0x1e0] sm:$0xff] }
  0xe3   :  { %v327_v6 = vsel %vm322_vm5, %v3263_v38, %v3264_v30  ;;  %v296_v9 = vmul.f32 %v1766_v15, %v276_v35  ;;  %v297_v7 = vmul.f32 %v1767_v17, %v280_v61  ;;  %v325_v34 = vsel %vm322_vm5, %v3266_v33, %v3265_v45  ;;  %v3269_v15 = vld [vmem:[#allocation19_spill] sm:$0xff] }
  0xe4   :  { %v329_v46 = vsel %vm322_vm5, %v3265_v45, %v3266_v33  ;;  %v300_v49 = vadd.f32 %v292_v39, %v250_v12  ;;  %v301_v19 = vadd.f32 %v293_v40, %v251_v16  ;;  %v324_v22 = vsel %vm322_vm5, %v3268_v52, %v3267_v51  ;;  %v1774_v39 = vld [vmem:[%s3209_s2 + $0x1b0] sm:$0xff]  ;;  %v1775_v40 = vld [vmem:[%s3209_s2 + $0x1b8] sm:$0xff]  ;;  %v1781_v35 = vld [vmem:[%s3209_s2 + $0x1e8] sm:$0xff] }
  0xe5   :  { %v328_v54 = vsel %vm322_vm5, %v3267_v51, %v3268_v52  ;;  %v340_v55 = vmul.f32 %v1768_v18, %v323_v32  ;;  %v341_v58 = vmul.f32 %v1769_v2, %v327_v6  ;;  %v373_v21 = vsel %vm372_vm6, %v2388_v14, %v2433_v63  ;;  %v1784_v45 = vld [vmem:[%s3209_s2 + $0x200] sm:$0xff] }
  0xe6   :  { %v377_v62 = vsel %vm372_vm6, %v2433_v63, %v2388_v14  ;;  %v344_v8 = vmul.f32 %v1772_v11, %v325_v34  ;;  %v345_v47 = vmul.f32 %v1773_v44, %v329_v46  ;;  %v374_v36 = vsel %vm372_vm6, %v2386_v26, %v2510_v4 }
  0xe7   :  { %v378_v14 = vsel %vm372_vm6, %v2510_v4, %v2386_v26  ;;  %v304_v63 = vadd.f32 %v296_v9, %v254_v10  ;;  %v305_v59 = vadd.f32 %v297_v7, %v255_v20  ;;  %v342_v12 = vmul.f32 %v1770_v50, %v324_v22 }
  0xe8   :  { %v343_v16 = vmul.f32 %v1771_v48, %v328_v54  ;;  %v326_v17 = vsel %vm322_vm5, %v3269_v15, %v2308_v56  ;;  %v330_v26 = vsel %vm322_vm5, %v2308_v56, %v3269_v15  ;;  %v390_v4 = vmul.f32 %v1776_v24, %v373_v21 }
  0xe9   :  { %v391_v1 = vmul.f32 %v1777_v13, %v377_v62  ;;  %v375_v61 = vsel %vm372_vm6, %v2435_v31, %v2508_v43  ;;  %v379_v56 = vsel %vm372_vm6, %v2508_v43, %v2435_v31  ;;  %v392_v10 = vmul.f32 %v1778_v23, %v374_v36  ;;  %v1785_v43 = vld [vmem:[%s3209_s2 + $0x208] sm:$0xff]  ;;  %v1788_v23 = vld [vmem:[%s3209_s2 + $0x220] sm:$0xff] }
  0xea   :  { %v393_v20 = vmul.f32 %v1779_v53, %v378_v14  ;;  %v348_v38 = vadd.f32 %v340_v55, %v298_v37  ;;  %v349_v30 = vadd.f32 %v341_v58, %v299_v25  ;;  %v352_v32 = vadd.f32 %v344_v8, %v302_v28  ;;  %v1786_v37 = vld [vmem:[%s3209_s2 + $0x210] sm:$0xff]  ;;  %v1787_v25 = vld [vmem:[%s3209_s2 + $0x218] sm:$0xff] }
  0xeb   :  { %v353_v6 = vadd.f32 %v345_v47, %v303_v3  ;;  %v350_v9 = vadd.f32 %v342_v12, %v300_v49  ;;  %v351_v7 = vadd.f32 %v343_v16, %v301_v19  ;;  %v346_v11 = vmul.f32 %v1774_v39, %v326_v17  ;;  %v1782_v49 = vld [vmem:[%s3209_s2 + $0x1f0] sm:$0xff]  ;;  %v1783_v19 = vld [vmem:[%s3209_s2 + $0x1f8] sm:$0xff] }
  0xec   :  { %v347_v44 = vmul.f32 %v1775_v40, %v330_v26  ;;  %v398_v33 = vadd.f32 %v390_v4, %v348_v38  ;;  %v399_v34 = vadd.f32 %v391_v1, %v349_v30  ;;  %v394_v46 = vmul.f32 %v1780_v27, %v375_v61  ;;  %v1791_v61 = vld [vmem:[%s3209_s2 + $0x238] sm:$0xff] }
  0xed   :  { %v2555_v29 = vpop.permute.xlu1 %463  ;;  %v395_v31 = vmul.f32 %v1781_v35, %v379_v56  ;;  %v400_v28 = vadd.f32 %v392_v10, %v350_v9  ;;  %v401_v3 = vadd.f32 %v393_v20, %v351_v7  ;;  %v354_v8 = vadd.f32 %v346_v11, %v304_v63  ;;  %v1790_v35 = vld [vmem:[%s3209_s2 + $0x230] sm:$0xff] }
  0xee   :  { %v2557_v5 = vpop.permute.xlu0 %458  ;;  %v402_v40 = vadd.f32 %v394_v46, %v352_v32 }
  0xef   :  { %v403_v15 = vadd.f32 %v395_v31, %v353_v6 }
  0xf1   :  { %v2573_v41 = vpop.permute.xlu1 %468 }
  0xf2   :  { %v2575_v42 = vpop.permute.xlu0 %362 }
  0xf5   :  { %v371_v0 = vpop.permute.xlu1 %370 }
  0xf6   :  { %v407_v60 = vpop.permute.xlu0 %406  ;;  %v376_v50 = vsel %vm372_vm6, %v2575_v42, %v371_v0  ;;  %v380_v48 = vsel %vm372_vm6, %v371_v0, %v2575_v42  ;;  %v355_v42 = vadd.f32 %v347_v44, %v305_v59 }
  0xf7   :  { %v396_v0 = vmul.f32 %v1782_v49, %v376_v50  ;;  %v397_v47 = vmul.f32 %v1783_v19, %v380_v48 }
  0xf9   :  { %v409_v18 = vpop.permute.xlu1 %408  ;;  %v404_v27 = vadd.f32 %v396_v0, %v354_v8  ;;  %v405_v20 = vadd.f32 %v397_v47, %v355_v42  ;;  %v3273_v42 = vld [vmem:[#allocation4_spill] sm:$0xff] }
  0xfa   :  { %v411_v2 = vpop.permute.xlu0 %410  ;;  %v543_v0 = vadd.f32 1.0, %v3273_v42  ;;  %vm579_vm14 = vcmp.ge.f32.partialorder %v3273_v42, 1.0 }
  0xfc   :  { %vm547_vm12 = vcmp.lt.f32.partialorder %v543_v0, 2.0 }
  0xfd   :  { %v415_v51 = vpop.permute.xlu1 %414 }
  0xfe   :  { %v417_v52 = vpop.permute.xlu0 %416  ;;  %v423_v22 = vsel %vm422_vm7, %v407_v60, %v415_v51  ;;  %v427_v54 = vsel %vm422_vm7, %v415_v51, %v407_v60  ;;  %v1789_v60 = vld [vmem:[%s3209_s2 + $0x228] sm:$0xff] }
  0xff   :  { %v424_v55 = vsel %vm422_vm7, %v409_v18, %v417_v52  ;;  %v428_v58 = vsel %vm422_vm7, %v417_v52, %v409_v18  ;;  %v440_v24 = vmul.f32 %v1784_v45, %v423_v22  ;;  %v441_v13 = vmul.f32 %v1785_v43, %v427_v54  ;;  %v3270_v54 = vld [vmem:[#allocation2_spill] sm:$0xff] }
 0x100   :  { %v442_v21 = vmul.f32 %v1786_v37, %v424_v55  ;;  %v443_v62 = vmul.f32 %v1787_v25, %v428_v58  ;;  %v542_v55 = vadd.f32 1.0, %v3270_v54  ;;  %v3271_v58 = vld [vmem:[#allocation3_spill] sm:$0xff]  ;;  %vm578_vm11 = vcmp.ge.f32.partialorder %v3270_v54, 1.0 }
 0x101   :  { %v448_v53 = vadd.f32 %v440_v24, %v398_v33  ;;  %v449_v36 = vadd.f32 %v441_v13, %v399_v34  ;;  %v419_v16 = vpop.permute.xlu1 %418  ;;  %v541_v24 = vadd.f32 1.0, %v3271_v58  ;;  %v3272_v13 = vmov 0  }
 0x102   :  { %v450_v14 = vadd.f32 %v442_v21, %v400_v28  ;;  %v451_v12 = vadd.f32 %v443_v62, %v401_v3  ;;  %v474_v39 = vpop.permute.xlu0 %473  ;;  %v425_v63 = vsel %vm422_vm7, %v411_v2, %v419_v16  ;;  %v429_v59 = vsel %vm422_vm7, %v419_v16, %v411_v2 }
 0x103   :  { %v444_v17 = vmul.f32 %v1788_v23, %v425_v63  ;;  %v445_v26 = vmul.f32 %v1789_v60, %v429_v59  ;;  %v2731_v56 = vadd.f32 %v2557_v5, %v448_v53  ;;  %v2734_v10 = vadd.f32 %v2557_v5, %v449_v36  ;;  %v3274_v23 = vld [vmem:[#allocation5_spill] sm:$0xff] }
 0x104   :  { %v2719_v4 = vadd.f32 %v2555_v29, %v450_v14  ;;  %v2722_v1 = vadd.f32 %v2555_v29, %v451_v12  ;;  %vm546_vm8 = vcmp.lt.f32.partialorder %v542_v55, 2.0  ;;  %vm577_vm9 = vcmp.ge.f32.partialorder %v3271_v58, 1.0 }
 0x105   :  { %v452_v18 = vadd.f32 %v444_v17, %v402_v40  ;;  %v453_v2 = vadd.f32 %v445_v26, %v403_v15  ;;  %v413_v29 = vpop.permute.xlu1 %412  ;;  %v484_v9 = vadd.f32 %v2734_v10, %v2731_v56  ;;  %v496_v5 = vmul.f32 %v2731_v56, %v2731_v56 }
 0x106   :  { %v421_v38 = vpop.permute.xlu0 %420  ;;  %v487_v30 = vadd.f32 %v2722_v1, %v2719_v4  ;;  %v497_v33 = vmul.f32 %v2734_v10, %v2734_v10  ;;  %v498_v34 = vmul.f32 %v2719_v4, %v2719_v4  ;;  %v499_v37 = vmul.f32 %v2722_v1, %v2722_v1 }
 0x107   :  { %v426_v32 = vsel %vm422_vm7, %v413_v29, %v421_v38  ;;  %v430_v6 = vsel %vm422_vm7, %v421_v38, %v413_v29  ;;  %v2747_v44 = vadd.f32 %v2573_v41, %v452_v18  ;;  %v2750_v45 = vadd.f32 %v2573_v41, %v453_v2  ;;  %485 = vadd.xlane.f32.xlu1 %v484_v9 }
 0x108   :  { %v446_v7 = vmul.f32 %v1790_v35, %v426_v32  ;;  %v447_v11 = vmul.f32 %v1791_v61, %v430_v6  ;;  %488 = vadd.xlane.f32.xlu0 %v487_v30  ;;  %v504_v25 = vadd.f32 %v497_v33, %v496_v5  ;;  %v507_v19 = vadd.f32 %v499_v37, %v498_v34 }
 0x109   :  { %v490_v43 = vadd.f32 %v2750_v45, %v2747_v44  ;;  %v500_v41 = vmul.f32 %v2747_v44, %v2747_v44  ;;  %v501_v28 = vmul.f32 %v2750_v45, %v2750_v45  ;;  %v550_v21 = vsel %vm546_vm8, 1, %v3272_v13 }
 0x10a   :  { %v454_v46 = vadd.f32 %v446_v7, %v404_v27  ;;  %v455_v31 = vadd.f32 %v447_v11, %v405_v20  ;;  %vm545_vm10 = vcmp.lt.f32.partialorder %v541_v24, 2.0  ;;  %v581_v62 = vsel %vm577_vm9, 1, %v3272_v13 }
 0x10b   :  { %505 = vadd.xlane.f32.xlu1 %v504_v25  ;;  %v510_v50 = vadd.f32 %v501_v28, %v500_v41  ;;  %v549_v8 = vsel %vm545_vm10, 1, %v3272_v13  ;;  %v582_v47 = vsel %vm578_vm11, 1, %v3272_v13  ;;  %v544_v60 = vadd.f32 1.0, %v3274_v23 }
 0x10c   :  { %491 = vadd.xlane.f32.xlu0 %v490_v43  ;;  %v2764_v3 = vadd.f32 %v474_v39, %v454_v46  ;;  %v2766_v49 = vadd.f32 %v474_v39, %v455_v31  ;;  %v551_v53 = vsel %vm547_vm12, 1, %v3272_v13  ;;  %v583_v14 = vsel %vm579_vm14, 1, %v3272_v13 }
 0x10d   :  { %vm548_vm13 = vcmp.lt.f32.partialorder %v544_v60, 2.0  ;;  %vm580_vm15 = vcmp.ge.f32.partialorder %v3274_v23, 1.0  ;;  %v3275_v35 = vlaneseq  ;;  %vm777_vm11 = vcmask 261120  }
 0x10e   :  { %v502_v48 = vmul.f32 %v2764_v3, %v2764_v3  ;;  %v503_v51 = vmul.f32 %v2766_v49, %v2766_v49  ;;  %v493_v52 = vadd.f32 %v2766_v49, %v2764_v3  ;;  %v552_v36 = vsel %vm548_vm13, 1, %v3272_v13 }
 0x10f   :  { %511 = vadd.xlane.f32.xlu1 %v510_v50  ;;  %v584_v12 = vsel %vm580_vm15, 1, %v3272_v13  ;;  %v2794_v61 = vshrl.u32 %v3275_v35, 7 }
 0x110   :  { %508 = vadd.xlane.f32.xlu0 %v507_v19  ;;  %v513_v22 = vadd.f32 %v503_v51, %v502_v48 }
 0x111   :  { %vm527_vm1 = vcmp.lt.s32.totalorder %v2794_v61, 7  ;;  %vm536_vm4 = vcmp.lt.s32.totalorder %v2794_v61, 1 }
 0x113   :  { %514 = vadd.xlane.f32.xlu1 %v513_v22 }
 0x114   :  { %494 = vadd.xlane.f32.xlu0 %v493_v52 }
 0x124   :  { %557 = vperm.xlu1 %1909, %v550_v21  }
 0x128   :  { %586 = vperm.xlu1 %1909, %v581_v62  }
 0x12a   :  { %554 = vperm.xlu0 %1908, %v549_v8  }
 0x12c   :  { %589 = vperm.xlu1 %1909, %v582_v47  }
 0x130   :  { %560 = vperm.xlu1 %1909, %v551_v53  }
 0x134   :  { %563 = vperm.xlu1 %1909, %v552_v36  }
 0x138   :  { %592 = vperm.xlu1 %1909, %v583_v14  }
 0x13c   :  { %595 = vperm.xlu1 %1909, %v584_v12  }
 0x194   :  { %v486_v39 = vpop.xlane.xlu1 %485 }
 0x195   :  { %v489_v16 = vpop.xlane.xlu0 %488 }
 0x198   :  { %v506_v15 = vpop.xlane.xlu1 %505 }
 0x199   :  { %v492_v40 = vpop.xlane.xlu0 %491  ;;  %v517_v18 = vsel %vm516_vm0, %v486_v39, %v506_v15 }
 0x19a   :  { %v521_v32 = vrot.slane %v517_v18, 1  ;;  %v532_v5 = vrot.slane %v517_v18, 7 }
 0x19c   :  { %v512_v59 = vpop.xlane.xlu1 %511 }
 0x19d   :  { %v509_v63 = vpop.xlane.xlu0 %508  ;;  %v519_v20 = vsel %vm516_vm0, %v492_v40, %v512_v59 }
 0x19e   :  { %v518_v27 = vsel %vm516_vm0, %v489_v16, %v509_v63  ;;  %v523_v30 = vrot.slane %v519_v20, 1  ;;  %v534_v21 = vrot.slane %v519_v20, 7 }
 0x19f   :  { %v522_v29 = vrot.slane %v518_v27, 1  ;;  %v533_v33 = vrot.slane %v518_v27, 7 }
 0x1a0   :  { %v515_v26 = vpop.xlane.xlu1 %514 }
 0x1a1   :  { %v495_v17 = vpop.xlane.xlu0 %494  ;;  %v530_v7 = vsel %vm527_vm1, %v521_v32, %v522_v29  ;;  %v529_v34 = vsel %vm527_vm1, %v522_v29, %v523_v30  ;;  %v539_v50 = vsel %vm536_vm4, %v532_v5, %v533_v33  ;;  %v538_v23 = vsel %vm536_vm4, %v533_v33, %v534_v21  ;;  %v2877_v33 = vld [vmem:[%s3208_s4] sm:$0xff] }
 0x1a2   :  { %v520_v2 = vsel %vm516_vm0, %v495_v17, %v515_v26 }
 0x1a3   :  { %v535_v6 = vrot.slane %v520_v2, 7  ;;  %v524_v55 = vrot.slane %v520_v2, 1 }
 0x1a4   :  { %v2802_v38 = vpop.permute.xlu1 %557 }
 0x1a5   :  { %vm566_vm2 = vcmp.eq.s32.totalorder %v2802_v38, 1  ;;  %v540_v37 = vsel %vm536_vm4, %v535_v6, %v532_v5  ;;  %v528_v62 = vsel %vm527_vm1, %v523_v30, %v524_v55  ;;  %v531_v47 = vsel %vm527_vm1, %v524_v55, %v521_v32 }
 0x1a6   :  { %v570_v31 = vsel %vm566_vm2, %v529_v34, 0.0  ;;  %v537_v39 = vsel %vm536_vm4, %v534_v21, %v535_v6  ;;  %v2898_v21 = vld [vmem:[%s3208_s4 + $0x18] sm:$0xff] }
 0x1a7   :  { %v574_v19 = vadd.f32 %v570_v31, %v518_v27 }
 0x1a8   :  { %v2812_v11 = vpop.permute.xlu1 %586 }
 0x1a9   :  { %v2806_v9 = vpop.permute.xlu0 %554  ;;  %vm597_vm5 = vcmp.eq.s32.totalorder %v2812_v11, 1 }
 0x1aa   :  { %vm565_vm3 = vcmp.eq.s32.totalorder %v2806_v9, 1  ;;  %v601_v25 = vsel %vm597_vm5, %v540_v37, 0.0 }
 0x1ab   :  { %v569_v46 = vsel %vm565_vm3, %v530_v7, 0.0 }
 0x1ac   :  { %v573_v43 = vadd.f32 %v569_v46, %v517_v18  ;;  %v2825_v28 = vpop.permute.xlu1 %589 }
 0x1ad   :  { %vm598_vm6 = vcmp.eq.s32.totalorder %v2825_v28, 1 }
 0x1ae   :  { %v605_v41 = vadd.f32 %v601_v25, %v573_v43  ;;  %v602_v51 = vsel %vm598_vm6, %v539_v50, 0.0  ;;  %v2884_v25 = vld [vmem:[%s3208_s4 + $0x8] sm:$0xff] }
 0x1af   :  { %v606_v52 = vadd.f32 %v602_v51, %v574_v19  ;;  %v1950_v51 = vmov 1  }
 0x1b0   :  { %v2830_v48 = vmul.f32 0.001953125, %v605_v41  ;;  %v2834_v22 = vpop.permute.xlu1 %560  ;;  %1910 = vset.pattern.permute.xlu1 %v1950_v51  ;;  %1911 = vset.pattern.permute.xlu0 %v1950_v51 }
 0x1b1   :  { %v2838_v58 = vmul.f32 0.001953125, %v606_v52  ;;  %vm567_vm7 = vcmp.eq.s32.totalorder %v2834_v22, 1 }
 0x1b2   :  { %v613_v54 = vmul.f32 %v2830_v48, %v2830_v48  ;;  %v571_v8 = vsel %vm567_vm7, %v528_v62, 0.0 }
 0x1b3   :  { %v614_v24 = vmul.f32 %v2838_v58, %v2838_v58  ;;  %v575_v0 = vadd.f32 %v571_v8, %v519_v20 }
 0x1b4   :  { %621 = vrot.lane.b32.xlu1 %v613_v54, %s1944_s14  ;;  %v2844_v13 = vpop.permute.xlu1 %563  ;;  %v2891_v54 = vld [vmem:[%s3208_s4 + $0x10] sm:$0xff] }
 0x1b5   :  { %623 = vrot.lane.b32.xlu0 %v614_v24, %s1944_s14  ;;  %vm568_vm8 = vcmp.eq.s32.totalorder %v2844_v13, 1 }
 0x1b6   :  { %v572_v60 = vsel %vm568_vm8, %v531_v47, 0.0 }
 0x1b7   :  { %v576_v12 = vadd.f32 %v572_v60, %v520_v2 }
 0x1b8   :  { %v2852_v42 = vpop.permute.xlu1 %592 }
 0x1b9   :  { %vm599_vm9 = vcmp.eq.s32.totalorder %v2852_v42, 1 }
 0x1ba   :  { %v603_v53 = vsel %vm599_vm9, %v538_v23, 0.0 }
 0x1bb   :  { %v607_v36 = vadd.f32 %v603_v53, %v575_v0 }
 0x1bc   :  { %v2863_v14 = vpop.permute.xlu1 %595 }
 0x1bd   :  { %v611_v16 = vmul.f32 0.001953125, %v607_v36  ;;  %vm600_vm10 = vcmp.eq.s32.totalorder %v2863_v14, 1 }
 0x1be   :  { %v604_v40 = vsel %vm600_vm10, %v537_v39, 0.0  ;;  %v1952_v39 = vmov 2  }
 0x1bf   :  { %v608_v15 = vadd.f32 %v604_v40, %v576_v12  ;;  %v615_v63 = vmul.f32 %v611_v16, %v611_v16 }
 0x1c1   :  { %v612_v59 = vmul.f32 0.001953125, %v608_v15  ;;  %625 = vrot.lane.b32.xlu1 %v615_v63, %s1944_s14 }
 0x1c3   :  { %v616_v17 = vmul.f32 %v612_v59, %v612_v59 }
 0x1c5   :  { %627 = vrot.lane.b32.xlu0 %v616_v17, %s1944_s14 }
 0x226   :  { %v622_v26 = vpop.permute.xlu1 %621 }
 0x227   :  { %v633_v27 = vsub.f32 %v2830_v48, %v622_v26  ;;  %v624_v20 = vpop.permute.xlu0 %623  ;;  %v1953_v26 = vmov 0.0  }
 0x228   :  { %v634_v18 = vsub.f32 %v2838_v58, %v624_v20  ;;  %862 = vmatprep.mubr.f32.mxu1 %v1953_v26  ;;  %1225 = vmatprep.mubr.f32.mxu0 %v1953_v26 }
 0x229   :  { %v637_v35 = vmax.f32 %v633_v27, 0.0  ;;  %v1954_v27 = vmov 3  }
 0x22a   :  { %v638_v29 = vmax.f32 %v634_v18, 0.0 }
 0x22b   :  { %v641_v2 = vadd.f32 1e-05, %v637_v35 }
 0x22c   :  { %v642_v30 = vadd.f32 1e-05, %v638_v29 }
 0x22d   :  { %1920 = vrsqrt.f32 %v641_v2 }
 0x22e   :  { %1922 = vrsqrt.f32 %v642_v30 }
 0x233   :  { %v626_v32 = vpop.permute.xlu1 %625 }
 0x234   :  { %v635_v6 = vsub.f32 %v611_v16, %v626_v32 }
 0x236   :  { %v639_v7 = vmax.f32 %v635_v6, 0.0 }
 0x237   :  { %v1921_v5 = vpop.eup %1920  ;;  %v628_v46 = vpop.permute.xlu0 %627 }
 0x238   :  { %v649_v34 = vmul.f32 %v2877_v33, %v1921_v5  ;;  %v1923_v31 = vpop.eup %1922  ;;  %v643_v43 = vadd.f32 1e-05, %v639_v7  ;;  %v636_v37 = vsub.f32 %v612_v59, %v628_v46  ;;  %v26_v46 = vld [vmem:[%s3210_s3] sm:$0xff] }
 0x239   :  { %v650_v41 = vmul.f32 %v2884_v25, %v1923_v31 }
 0x23a   :  { %657 = vrot.lane.b32.xlu1 %v649_v34, %s1945_s15  ;;  %1924 = vrsqrt.f32 %v643_v43  ;;  %v640_v19 = vmax.f32 %v636_v37, 0.0 }
 0x23b   :  { %659 = vrot.lane.b32.xlu0 %v650_v41, %s1945_s15 }
 0x23c   :  { %v644_v50 = vadd.f32 1e-05, %v640_v19 }
 0x23e   :  { %1926 = vrsqrt.f32 %v644_v50 }
 0x244   :  { %v1925_v52 = vpop.eup %1924 }
 0x245   :  { %v651_v55 = vmul.f32 %v2891_v54, %v1925_v52 }
 0x247   :  { %661 = vrot.lane.b32.xlu1 %v651_v55, %s1945_s15 }
 0x248   :  { %v1927_v24 = vpop.eup %1926 }
 0x249   :  { %v652_v62 = vmul.f32 %v2898_v21, %v1927_v24 }
 0x24b   :  { %663 = vrot.lane.b32.xlu0 %v652_v62, %s1945_s15 }
 0x2ac   :  { %v658_v8 = vpop.permute.xlu1 %657 }
 0x2ad   :  { %v669_v0 = vmul.f32 %v658_v8, %v2830_v48  ;;  %v660_v47 = vpop.permute.xlu0 %659 }
 0x2ae   :  { %v670_v23 = vmul.f32 %v660_v47, %v2838_v58 }
 0x2af   :  { %677 = vrot.lane.b32.xlu1 %v669_v0, %s1951_s10 }
 0x2b0   :  { %679 = vrot.lane.b32.xlu0 %v670_v23, %s1951_s10 }
 0x2b9   :  { %v662_v60 = vpop.permute.xlu1 %661 }
 0x2ba   :  { %v671_v53 = vmul.f32 %v662_v60, %v611_v16 }
 0x2bc   :  { %681 = vrot.lane.b32.xlu1 %v671_v53, %s1951_s10 }
 0x2bd   :  { %v664_v36 = vpop.permute.xlu0 %663 }
 0x2be   :  { %v672_v12 = vmul.f32 %v664_v36, %v612_v59 }
 0x2c0   :  { %683 = vrot.lane.b32.xlu0 %v672_v12, %s1951_s10  ;;  %694 = vperm.xlu1 %1910, %v649_v34  }
 0x2c4   :  { %698 = vperm.xlu0 %1911, %v650_v41   ;;  %706 = vperm.xlu1 %1910, %v652_v62  }
 0x2c8   :  { %702 = vperm.xlu0 %1911, %v651_v55   ;;  %1912 = vset.pattern.permute.xlu1 %v1952_v39 }
 0x2cc   :  { %1913 = vset.pattern.permute.xlu0 %v1952_v39  ;;  %v28_v39 = vld [vmem:[%s3210_s3 + $0x10] sm:$0xff] }
 0x321   :  { %v678_v48 = vpop.permute.xlu1 %677 }
 0x322   :  { %v689_v40 = vsub.f32 %v2877_v33, %v678_v48  ;;  %v680_v15 = vpop.permute.xlu0 %679 }
 0x323   :  { %v690_v58 = vsub.f32 %v2884_v25, %v680_v15 }
 0x324   :  { %719 = vperm.xlu1 %1912, %v689_v40  }
 0x328   :  { %724 = vperm.xlu1 %1912, %v690_v58  }
 0x32e   :  { %v682_v16 = vpop.permute.xlu1 %681 }
 0x32f   :  { %v691_v63 = vsub.f32 %v2891_v54, %v682_v16 }
 0x331   :  { %729 = vperm.xlu0 %1913, %v691_v63  }
 0x332   :  { %v684_v59 = vpop.permute.xlu0 %683 }
 0x333   :  { %v692_v17 = vsub.f32 %v2898_v21, %v684_v59 }
 0x335   :  { %734 = vperm.xlu1 %1912, %v692_v17   ;;  %1915 = vset.pattern.permute.xlu0 %v1954_v27  ;;  %v785_v17 = vsel %vm777_vm11, %v28_v39, 0 }
 0x336   :  { %766 = vperm.xlu0 %1915, %v2884_v25  }
 0x339   :  { %1914 = vset.pattern.permute.xlu1 %v1954_v27 }
 0x33a   :  { %762 = vperm.xlu1 %1914, %v2877_v33   ;;  %1916 = vset.pattern.permute.xlu0 %v1950_v51 }
 0x33e   :  { %770 = vperm.xlu1 %1914, %v2891_v54  }
 0x33f   :  { %v695_v35 = vpop.permute.xlu1 %694 }
 0x340   :  { %v709_v18 = vmul.f32 %v695_v35, %v2731_v56  ;;  %v710_v2 = vmul.f32 %v695_v35, %v2734_v10  ;;  %v779_v10 = vsel %vm777_vm11, %v26_v46, 0 }
 0x341   :  { %v2925_v55 = vand.u32 4294901760, %v779_v10 }
 0x342   :  { %774 = vperm.xlu1 %1914, %v2898_v21  }
 0x343   :  { %v707_v20 = vpop.permute.xlu1 %706  ;;  %v699_v29 = vpop.permute.xlu0 %698  ;;  %v2933_v36 = vsub.f32 %v779_v10, %v2925_v55 }
 0x344   :  { %v711_v5 = vmul.f32 %v699_v29, %v2719_v4  ;;  %v712_v7 = vmul.f32 %v699_v29, %v2722_v1  ;;  %v27_v4 = vld [vmem:[%s3210_s3 + $0x8] sm:$0xff]  ;;  %v716_v29 = vmul.f32 %v707_v20, %v2766_v49 }
 0x345   :  { %v782_v24 = vsel %vm777_vm11, %v27_v4, 0  ;;  %v865_v35 = vand.u32 4294901760, %v2933_v36 }
 0x346   :  { %1917 = vset.pattern.permute.xlu1 %v1950_v51  ;;  %v2935_v12 = vand.u32 4294901760, %v782_v24 }
 0x347   :  { %v703_v62 = vpop.permute.xlu0 %702  ;;  %v866_v49 = vsub.f32 %v2933_v36, %v865_v35 }
 0x348   :  { %v713_v48 = vmul.f32 %v703_v62, %v2747_v44  ;;  %v714_v40 = vmul.f32 %v703_v62, %v2750_v45  ;;  %v29_v44 = vld [vmem:[%s3210_s3 + $0x18] sm:$0xff]  ;;  %s1955_s3 = smov 125  }
 0x349   :  { %v788_v46 = vsel %vm777_vm11, %v29_v44, 0 }
 0x3a3   :  { %v720_v30 = vpop.permute.xlu1 %719 }
 0x3a4   :  { %v737_v32 = vadd.f32 %v720_v30, %v709_v18  ;;  %v738_v6 = vadd.f32 %v720_v30, %v710_v2  ;;  %v2959_v18 = vsub.f32 %v782_v24, %v2935_v12  ;;  %v715_v2 = vmul.f32 %v707_v20, %v2764_v3 }
 0x3a5   :  { %v2980_v24 = vand.u32 4294901760, %v788_v46 }
 0x3a6   :  { %v746_v34 = vmax.f32 %v738_v6, 0.0  ;;  %v745_v31 = vmax.f32 %v737_v32, 0.0  ;;  %v876_v20 = vand.u32 4294901760, %v2959_v18 }
 0x3a7   :  { %v725_v43 = vpop.permute.xlu1 %724 }
 0x3a8   :  { %v739_v37 = vadd.f32 %v725_v43, %v711_v5  ;;  %v740_v56 = vadd.f32 %v725_v43, %v712_v7  ;;  %v754_v41 = vmin.f32 %v746_v34, 6.0  ;;  %v753_v1 = vmin.f32 %v745_v31, 6.0 }
 0x3a9   :  { %v2966_v34 = vand.u32 4294901760, %v785_v17  ;;  %v877_v44 = vsub.f32 %v2959_v18, %v876_v20 }
 0x3aa   :  { %v747_v19 = vmax.f32 %v739_v37, 0.0  ;;  %v748_v50 = vmax.f32 %v740_v56, 0.0  ;;  %v790_v8 = vand.u32 4294901760, %v754_v41  ;;  %v792_v23 = vand.u32 4294901760, %v753_v1 }
 0x3ac   :  { %v755_v51 = vmin.f32 %v747_v19, 6.0  ;;  %v756_v52 = vmin.f32 %v748_v50, 6.0  ;;  %v2944_v58 = vsub.f32 %v754_v41, %v790_v8  ;;  %v2963_v6 = vsub.f32 %v753_v1, %v792_v23 }
 0x3ae   :  { %v794_v0 = vand.u32 4294901760, %v756_v52  ;;  %v796_v47 = vand.u32 4294901760, %v755_v51  ;;  %v909_v7 = vand.u32 4294901760, %v2944_v58  ;;  %v915_v1 = vand.u32 4294901760, %v2963_v6 }
 0x3b0   :  { %v2928_v60 = vsub.f32 %v756_v52, %v794_v0  ;;  %v2930_v53 = vpack.c.bf16 %v794_v0, %v790_v8  ;;  %v2942_v15 = vpack.c.bf16 %v796_v47, %v792_v23  ;;  %v730_v16 = vpop.permute.xlu0 %729  ;;  %v2954_v45 = vsub.f32 %v755_v51, %v796_v47 }
 0x3b1   :  { %v741_v63 = vadd.f32 %v730_v16, %v713_v48  ;;  %v742_v59 = vadd.f32 %v730_v16, %v714_v40  ;;  %v910_v51 = vsub.f32 %v2944_v58, %v909_v7  ;;  %v2978_v52 = vsub.f32 %v785_v17, %v2966_v34 }
 0x3b2   :  { %1793 = vmatprep.subr.bf16.mxu1 %v2930_v53  ;;  %1817 = vmatprep.subr.bf16.mxu0 %v2930_v53  ;;  %v921_v27 = vand.u32 4294901760, %v2928_v60  ;;  %v927_v10 = vand.u32 4294901760, %v2954_v45  ;;  %v867_v48 = vand.u32 4294901760, %v866_v49  ;;  %v916_v17 = vsub.f32 %v2963_v6, %v915_v1 }
 0x3b3   :  { %1795 = vmatpush1.bf16.msra.mxu1 %v2942_v15  ;;  %1819 = vmatpush1.bf16.msra.mxu0 %v2942_v15  ;;  %v749_v30 = vmax.f32 %v741_v63, 0.0  ;;  %v750_v32 = vmax.f32 %v742_v59, 0.0 }
 0x3b4   :  { %v735_v5 = vpop.permute.xlu1 %734  ;;  %v922_v3 = vsub.f32 %v2928_v60, %v921_v27  ;;  %v928_v23 = vsub.f32 %v2954_v45, %v927_v10 }
 0x3b5   :  { %v757_v31 = vmin.f32 %v749_v30, 6.0  ;;  %v758_v43 = vmin.f32 %v750_v32, 6.0  ;;  %v743_v37 = vadd.f32 %v735_v5, %v715_v2  ;;  %v744_v56 = vadd.f32 %v735_v5, %v716_v29 }
 0x3b6   :  { %v923_v39 = vand.u32 4294901760, %v922_v3  ;;  %v887_v2 = vand.u32 4294901760, %v2978_v52  ;;  %v2995_v29 = vsub.f32 %v788_v46, %v2980_v24  ;;  %v929_v3 = vand.u32 4294901760, %v928_v23 }
 0x3b7   :  { %v798_v41 = vand.u32 4294901760, %v758_v43  ;;  %v800_v19 = vand.u32 4294901760, %v757_v31  ;;  %v751_v50 = vmax.f32 %v743_v37, 0.0  ;;  %v752_v4 = vmax.f32 %v744_v56, 0.0 }
 0x3b8   :  { %v1824_v56 = vpack.c.bf16 %v921_v27, %v909_v7  ;;  %v878_v27 = vand.u32 4294901760, %v877_v44 }
 0x3b9   :  { %v2982_v62 = vsub.f32 %v758_v43, %v798_v41  ;;  %v2984_v8 = vsub.f32 %v757_v31, %v800_v19  ;;  %v759_v0 = vmin.f32 %v751_v50, 6.0  ;;  %v760_v47 = vmin.f32 %v752_v4, 6.0 }
 0x3ba   :  { %v911_v31 = vand.u32 4294901760, %v910_v51  ;;  %v888_v51 = vsub.f32 %v2978_v52, %v887_v2 }
 0x3bb   :  { %v939_v40 = vand.u32 4294901760, %v2984_v8  ;;  %v802_v16 = vand.u32 4294901760, %v760_v47  ;;  %v804_v63 = vand.u32 4294901760, %v759_v0  ;;  %v933_v59 = vand.u32 4294901760, %v2982_v62 }
 0x3bc   :  { %v1800_v46 = vpack.c.bf16 %v923_v39, %v911_v31  ;;  %v898_v39 = vand.u32 4294901760, %v2995_v29 }
 0x3bd   :  { %v2997_v30 = vsub.f32 %v760_v47, %v802_v16  ;;  %v2999_v32 = vsub.f32 %v759_v0, %v804_v63  ;;  %v3001_v5 = vpack.c.bf16 %v802_v16, %v798_v41  ;;  %v940_v43 = vsub.f32 %v2984_v8, %v939_v40 }
 0x3be   :  { %v3004_v37 = vpack.c.bf16 %v804_v63, %v800_v19  ;;  %v934_v4 = vsub.f32 %v2982_v62, %v933_v59  ;;  %v917_v41 = vand.u32 4294901760, %v916_v17  ;;  %v1826_v47 = vpack.c.bf16 %v927_v10, %v915_v1 }
 0x3bf   :  { %v951_v49 = vand.u32 4294901760, %v2999_v32  ;;  %1797 = vmatprep.subr.bf16.mxu1 %v3001_v5  ;;  %1821 = vmatprep.subr.bf16.mxu0 %v3001_v5  ;;  %v945_v50 = vand.u32 4294901760, %v2997_v30  ;;  %v941_v23 = vand.u32 4294901760, %v940_v43  ;;  %v1808_v1 = vpack.c.bf16 %v2928_v60, %v2944_v58 }
 0x3c0   :  { %1799 = vmatpush1.bf16.msra.mxu1 %v3004_v37  ;;  %1823 = vmatpush1.bf16.msra.mxu0 %v3004_v37  ;;  %v1802_v0 = vpack.c.bf16 %v929_v3, %v917_v41  ;;  %v935_v63 = vand.u32 4294901760, %v934_v4  ;;  %v1810_v60 = vpack.c.bf16 %v2954_v45, %v2963_v6  ;;  %v1814_v58 = vpack.c.bf16 %v2999_v32, %v2984_v8 }
 0x3c1   :  { %v952_v19 = vsub.f32 %v2999_v32, %v951_v49  ;;  %1801 = vmatprep.subr.bf16.mxu1 %v1800_v46  ;;  %1825 = vmatprep.subr.bf16.mxu0 %v1824_v56  ;;  %v946_v7 = vsub.f32 %v2997_v30, %v945_v50  ;;  %v1828_v16 = vpack.c.bf16 %v945_v50, %v933_v59 }
 0x3c2   :  { %v1830_v10 = vpack.c.bf16 %v951_v49, %v939_v40 }
 0x3c3   :  { %868 = vmatmul.mubr.f32.vlgmr.msra.gmra.mrb[0].mxu1 %v867_v48  ;;  %1229 = vmatmul.mubr.f32.vlgmr.msra.gmra.mrb[0].mxu0 %v865_v35  ;;  %v947_v17 = vand.u32 4294901760, %v946_v7  ;;  %v953_v31 = vand.u32 4294901760, %v952_v19  ;;  %v889_v35 = vand.u32 4294901760, %v888_v51  ;;  %v899_v48 = vsub.f32 %v2995_v29, %v898_v39 }
 0x3c4   :  { %1803 = vmatpush1.bf16.msra.mxu1 %v1802_v0  ;;  %1827 = vmatpush1.bf16.msra.mxu0 %v1826_v47 }
 0x3c5   :  { %1829 = vmatprep.subr.bf16.mxu0 %v1828_v16  ;;  %873 = vmatprep.mubr.f32.mxu1 %v1953_v26  ;;  %v1804_v44 = vpack.c.bf16 %v947_v17, %v935_v63  ;;  %v1806_v56 = vpack.c.bf16 %v953_v31, %v941_v23  ;;  %v900_v40 = vand.u32 4294901760, %v899_v48 }
 0x3c6   :  { %1234 = vmatprep.mubr.f32.mxu0 %v1953_v26 }
 0x3c7   :  { %879 = vmatmul.mubr.f32.gmra.mrb[2].mxu1 %v878_v27  ;;  %1805 = vmatprep.subr.bf16.mxu1 %v1804_v44 }
 0x3c8   :  { %1238 = vmatmul.mubr.f32.gmra.mrb[2].mxu0 %v876_v20  ;;  %1807 = vmatpush1.bf16.msra.mxu1 %v1806_v56  ;;  %v767_v20 = vpop.permute.xlu0 %766 }
 0x3c9   :  { %1831 = vmatpush1.bf16.msra.mxu0 %v1830_v10  ;;  %1809 = vmatprep.subr.bf16.mxu1 %v1808_v1 }
 0x3ca   :  { %1833 = vmatprep.subr.bf16.mxu0 %v2930_v53  ;;  %884 = vmatprep.mubr.f32.mxu1 %v1953_v26  ;;  %v1812_v53 = vpack.c.bf16 %v2997_v30, %v2982_v62 }
 0x3cb   :  { %1243 = vmatprep.mubr.f32.mxu0 %v1953_v26  ;;  %890 = vmatmul.mubr.f32.gmra.mrb[4].mxu1 %v889_v35 }
 0x3cc   :  { %1247 = vmatmul.mubr.f32.gmra.mrb[4].mxu0 %v887_v2  ;;  %895 = vmatprep.mubr.f32.mxu1 %v1953_v26 }
 0x3cd   :  { %1252 = vmatprep.mubr.f32.mxu0 %v1953_v26 }
 0x3cf   :  { %901 = vmatmul.mubr.f32.gmra.mrb[6].mxu1 %v900_v40 }
 0x3d0   :  { %1256 = vmatmul.mubr.f32.gmra.mrb[6].mxu0 %v898_v39  ;;  %1011 = vmatprep.mubr.f32.mxu1 %v1953_v26 }
 0x3d1   :  { %1350 = vmatprep.mubr.f32.mxu0 %v1953_v26 }
 0x3d3   :  { %1013 = vmatmul.mubr.f32.vlgmr.msra.gmra.mrb[0].mxu1 %v2925_v55 }
 0x3d4   :  { %1811 = vmatpush1.bf16.msra.mxu1 %v1810_v60  ;;  %1352 = vmatmul.mubr.f32.vlgmr.msra.gmra.mrb[0].mxu0 %v2925_v55 }
 0x3d5   :  { %1835 = vmatpush1.bf16.msra.mxu0 %v2942_v15  ;;  %1813 = vmatprep.subr.bf16.mxu1 %v1812_v53 }
 0x3d6   :  { %1837 = vmatprep.subr.bf16.mxu0 %v3001_v5  ;;  %1018 = vmatprep.mubr.f32.mxu1 %v1953_v26 }
 0x3d7   :  { %1357 = vmatprep.mubr.f32.mxu0 %v1953_v26  ;;  %1020 = vmatmul.mubr.f32.gmra.mrb[2].mxu1 %v2935_v12 }
 0x3d8   :  { %1815 = vmatpush1.bf16.msra.mxu1 %v1814_v58  ;;  %1359 = vmatmul.mubr.f32.gmra.mrb[2].mxu0 %v2935_v12 }
 0x3d9   :  { %1839 = vmatpush1.bf16.msra.mxu0 %v3004_v37  ;;  %1025 = vmatprep.mubr.f32.mxu1 %v1953_v26 }
 0x3da   :  { %1364 = vmatprep.mubr.f32.mxu0 %v1953_v26 }
 0x3db   :  { %1027 = vmatmul.mubr.f32.gmra.mrb[4].mxu1 %v2966_v34 }
 0x3dc   :  { %1366 = vmatmul.mubr.f32.gmra.mrb[4].mxu0 %v2966_v34  ;;  %1032 = vmatprep.mubr.f32.mxu1 %v1953_v26 }
 0x3dd   :  { %1371 = vmatprep.mubr.f32.mxu0 %v1953_v26 }
 0x3df   :  { %1034 = vmatmul.mubr.f32.gmra.mrb[6].mxu1 %v2980_v24 }
 0x3e0   :  { %1373 = vmatmul.mubr.f32.gmra.mrb[6].mxu0 %v2980_v24  ;;  %1120 = vmatprep.mubr.f32.mxu1 %v1953_v26 }
 0x3e1   :  { %1451 = vmatprep.mubr.f32.mxu0 %v1953_v26 }
 0x3e3   :  { %1123 = vmatmul.mubr.f32.vlgmr.msra.gmra.mrb[0].mxu1 %v2933_v36 }
 0x3e4   :  { %1453 = vmatmul.mubr.f32.vlgmr.msra.gmra.mrb[0].mxu0 %v2925_v55  ;;  %1128 = vmatprep.mubr.f32.mxu1 %v1953_v26  ;;  %v763_v55 = vpop.permute.xlu1 %762 }
 0x3e5   :  { %1458 = vmatprep.mubr.f32.mxu0 %v1953_v26 }
 0x3e7   :  { %1131 = vmatmul.mubr.f32.gmra.mrb[2].mxu1 %v2959_v18 }
 0x3e8   :  { %1460 = vmatmul.mubr.f32.gmra.mrb[2].mxu0 %v2935_v12  ;;  %1136 = vmatprep.mubr.f32.mxu1 %v1953_v26 }
 0x3e9   :  { %1465 = vmatprep.mubr.f32.mxu0 %v1953_v26 }
 0x3eb   :  { %1139 = vmatmul.mubr.f32.gmra.mrb[4].mxu1 %v2978_v52 }
 0x3ec   :  { %1467 = vmatmul.mubr.f32.gmra.mrb[4].mxu0 %v2966_v34  ;;  %1144 = vmatprep.mubr.f32.mxu1 %v1953_v26 }
 0x3ed   :  { %1472 = vmatprep.mubr.f32.mxu0 %v1953_v26 }
 0x3ef   :  { %1147 = vmatmul.mubr.f32.gmra.mrb[6].mxu1 %v2995_v29 }
 0x3f0   :  { %1474 = vmatmul.mubr.f32.gmra.mrb[6].mxu0 %v2980_v24  ;;  %v771_v24 = vpop.permute.xlu1 %770 }
 0x3f4   :  { %v775_v0 = vpop.permute.xlu1 %774 }
 0x4b6   :  { %v1124_v36 = vpop.f32.mrb[0].mxu1 }
 0x4b7   :  { %v1840_v15 = vadd.f32 %v1124_v36, %v763_v55  ;;  %v1454_v12 = vpop.f32.mrb[0].mxu0  ;;  %v1126_v45 = vpop.f32.mrb[1].mxu1 }
 0x4b8   :  { %v1842_v18 = vadd.f32 %v1126_v45, %v763_v55  ;;  %v1456_v6 = vpop.f32.mrb[1].mxu0 }
 0x4b9   :  { %v3072_v62 = vadd.f32 %v1840_v15, %v1454_v12 }
 0x4ba   :  { %v3074_v52 = vadd.f32 %v1842_v18, %v1456_v6  ;;  %v1132_v34 = vpop.f32.mrb[2].mxu1 }
 0x4bb   :  { %v1492_v26 = vmul.f32 %v3072_v62, %v3072_v62  ;;  %v1844_v8 = vadd.f32 %v1132_v34, %v767_v20  ;;  %v1461_v59 = vpop.f32.mrb[2].mxu0  ;;  %v1134_v2 = vpop.f32.mrb[3].mxu1 }
 0x4bc   :  { %v1493_v29 = vmul.f32 %v3074_v52, %v3074_v52  ;;  %v1846_v30 = vadd.f32 %v1134_v2, %v767_v20  ;;  %v1463_v32 = vpop.f32.mrb[3].mxu0  ;;  %v1480_v5 = vadd.f32 %v3074_v52, %v3072_v62 }
 0x4bd   :  { %v3082_v43 = vadd.f32 %v1844_v8, %v1461_v59 }
 0x4be   :  { %v3084_v37 = vadd.f32 %v1846_v30, %v1463_v32  ;;  %v1140_v3 = vpop.f32.mrb[4].mxu1  ;;  %1481 = vadd.xlane.f32.xlu0 %v1480_v5  ;;  %v1500_v49 = vadd.f32 %v1493_v29, %v1492_v26 }
 0x4bf   :  { %v1494_v46 = vmul.f32 %v3082_v43, %v3082_v43  ;;  %v1848_v50 = vadd.f32 %v1140_v3, %v771_v24  ;;  %v1468_v4 = vpop.f32.mrb[4].mxu0  ;;  %v1142_v41 = vpop.f32.mrb[5].mxu1 }
 0x4c0   :  { %v1495_v19 = vmul.f32 %v3084_v37, %v3084_v37  ;;  %v1850_v27 = vadd.f32 %v1142_v41, %v771_v24  ;;  %v1470_v7 = vpop.f32.mrb[5].mxu0  ;;  %1501 = vadd.xlane.f32.xlu1 %v1500_v49  ;;  %v1483_v39 = vadd.f32 %v3084_v37, %v3082_v43 }
 0x4c1   :  { %v3090_v51 = vadd.f32 %v1848_v50, %v1468_v4 }
 0x4c2   :  { %v3092_v47 = vadd.f32 %v1850_v27, %v1470_v7  ;;  %v1148_v23 = vpop.f32.mrb[6].mxu1  ;;  %v1503_v16 = vadd.f32 %v1495_v19, %v1494_v46 }
 0x4c3   :  { %v1496_v63 = vmul.f32 %v3090_v51, %v3090_v51  ;;  %v1852_v17 = vadd.f32 %v1148_v23, %v775_v0  ;;  %v1475_v31 = vpop.f32.mrb[6].mxu0  ;;  %v1150_v44 = vpop.f32.mrb[7].mxu1 }
 0x4c4   :  { %v1497_v56 = vmul.f32 %v3092_v47, %v3092_v47  ;;  %v1854_v10 = vadd.f32 %v1150_v44, %v775_v0  ;;  %v1477_v1 = vpop.f32.mrb[7].mxu0  ;;  %1484 = vadd.xlane.f32.xlu1 %v1483_v39  ;;  %1504 = vadd.xlane.f32.xlu0 %v1503_v16  ;;  %v1486_v60 = vadd.f32 %v3092_v47, %v3090_v51 }
 0x4c5   :  { %v3100_v35 = vadd.f32 %v1852_v17, %v1475_v31 }
 0x4c6   :  { %v3102_v48 = vadd.f32 %v1854_v10, %v1477_v1  ;;  %v1506_v40 = vadd.f32 %v1497_v56, %v1496_v63 }
 0x4c7   :  { %v1498_v53 = vmul.f32 %v3100_v35, %v3100_v35 }
 0x4c8   :  { %1507 = vadd.xlane.f32.xlu1 %v1506_v40  ;;  %1487 = vadd.xlane.f32.xlu0 %v1486_v60  ;;  %v1499_v58 = vmul.f32 %v3102_v48, %v3102_v48  ;;  %v1489_v55 = vadd.f32 %v3102_v48, %v3100_v35 }
 0x4ca   :  { %v1509_v36 = vadd.f32 %v1499_v58, %v1498_v53 }
 0x4cc   :  { %1490 = vadd.xlane.f32.xlu0 %v1489_v55 }
 0x4d0   :  { %1510 = vadd.xlane.f32.xlu0 %v1509_v36 }
 0x54b   :  { %v1482_v15 = vpop.xlane.xlu0 %1481 }
 0x54d   :  { %v1502_v12 = vpop.xlane.xlu1 %1501 }
 0x54e   :  { %v1512_v20 = vsel %vm516_vm0, %v1482_v15, %v1502_v12 }
 0x54f   :  { %v1524_v24 = vrot.slane %v1512_v20, 7  ;;  %v1516_v30 = vrot.slane %v1512_v20, 1 }
 0x551   :  { %v1505_v45 = vpop.xlane.xlu0 %1504  ;;  %v1485_v18 = vpop.xlane.xlu1 %1484 }
 0x552   :  { %v1513_v6 = vsel %vm516_vm0, %v1485_v18, %v1505_v45 }
 0x553   :  { %v1525_v34 = vrot.slane %v1513_v6, 7  ;;  %v1517_v59 = vrot.slane %v1513_v6, 1 }
 0x555   :  { %v1488_v26 = vpop.xlane.xlu0 %1487  ;;  %v1508_v8 = vpop.xlane.xlu1 %1507  ;;  %v1530_v32 = vsel %vm536_vm4, %v1524_v24, %v1525_v34  ;;  %v1522_v49 = vsel %vm527_vm1, %v1516_v30, %v1517_v59 }
 0x556   :  { %v1514_v2 = vsel %vm516_vm0, %v1488_v26, %v1508_v8  ;;  %v1541_v4 = vsel %vm598_vm6, %v1530_v32, 0.0  ;;  %v1532_v41 = vsel %vm565_vm3, %v1522_v49, 0.0 }
 0x557   :  { %v1518_v29 = vrot.slane %v1514_v2, 1  ;;  %v1526_v19 = vrot.slane %v1514_v2, 7  ;;  %v1536_v63 = vadd.f32 %v1532_v41, %v1512_v20 }
 0x559   :  { %v1521_v5 = vsel %vm527_vm1, %v1517_v59, %v1518_v29  ;;  %v1491_v3 = vpop.xlane.xlu0 %1490  ;;  %v1529_v38 = vsel %vm536_vm4, %v1525_v34, %v1526_v19 }
 0x55a   :  { %v1533_v46 = vsel %vm566_vm2, %v1521_v5, 0.0  ;;  %v1542_v53 = vsel %vm599_vm9, %v1529_v38, 0.0 }
 0x55b   :  { %v1537_v50 = vadd.f32 %v1533_v46, %v1513_v6 }
 0x55d   :  { %v1511_v27 = vpop.xlane.xlu0 %1510  ;;  %v1545_v7 = vadd.f32 %v1541_v4, %v1537_v50 }
 0x55e   :  { %v1515_v0 = vsel %vm516_vm0, %v1491_v3, %v1511_v27 }
 0x55f   :  { %v1519_v23 = vrot.slane %v1515_v0, 1  ;;  %v1527_v39 = vrot.slane %v1515_v0, 7  ;;  %v3132_v16 = vmul.f32 0.001953125, %v1545_v7 }
 0x561   :  { %v1520_v28 = vsel %vm527_vm1, %v1518_v29, %v1519_v23  ;;  %v1523_v9 = vsel %vm527_vm1, %v1519_v23, %v1516_v30  ;;  %v1531_v17 = vsel %vm536_vm4, %v1527_v39, %v1524_v24  ;;  %v1528_v57 = vsel %vm536_vm4, %v1526_v19, %v1527_v39 }
 0x562   :  { %v1534_v31 = vsel %vm567_vm7, %v1520_v28, 0.0  ;;  %v1535_v44 = vsel %vm568_vm8, %v1523_v9, 0.0  ;;  %v1540_v56 = vsel %vm597_vm5, %v1531_v17, 0.0  ;;  %v1553_v60 = vmul.f32 %v3132_v16, %v3132_v16 }
 0x563   :  { %v1538_v10 = vadd.f32 %v1534_v31, %v1514_v2  ;;  %v1539_v1 = vadd.f32 %v1535_v44, %v1515_v0  ;;  %v1544_v40 = vadd.f32 %v1540_v56, %v1536_v63  ;;  %v1543_v13 = vsel %vm600_vm10, %v1528_v57, 0.0 }
 0x564   :  { %1562 = vrot.lane.b32.xlu0 %v1553_v60, %s1944_s14  ;;  %v1957_v56 = vmov 5  }
 0x565   :  { %v1548_v61 = vmul.f32 0.001953125, %v1544_v40  ;;  %v1546_v22 = vadd.f32 %v1542_v53, %v1538_v10  ;;  %v1547_v58 = vadd.f32 %v1543_v13, %v1539_v1 }
 0x567   :  { %v1552_v55 = vmul.f32 %v1548_v61, %v1548_v61  ;;  %v1550_v11 = vmul.f32 0.001953125, %v1546_v22  ;;  %v1551_v36 = vmul.f32 0.001953125, %v1547_v58 }
 0x568   :  { %1588 = vrot.lane.b32.xlu0 %v2877_v33, %s1955_s3 }
 0x569   :  { %1560 = vrot.lane.b32.xlu1 %v1552_v55, %s1944_s14  ;;  %v1554_v15 = vmul.f32 %v1550_v11, %v1550_v11  ;;  %v1555_v42 = vmul.f32 %v1551_v36, %v1551_v36 }
 0x56c   :  { %1592 = vrot.lane.b32.xlu0 %v2891_v54, %s1955_s3 }
 0x56d   :  { %1564 = vrot.lane.b32.xlu1 %v1554_v15, %s1944_s14 }
 0x571   :  { %1566 = vrot.lane.b32.xlu1 %v1555_v42, %s1944_s14  ;;  %s1956_s14 = smov 5  }
 0x575   :  { %1590 = vrot.lane.b32.xlu1 %v2884_v25, %s1955_s3 }
 0x579   :  { %1594 = vrot.lane.b32.xlu1 %v2898_v21, %s1955_s3 }
 0x5d6   :  { %v1563_v14 = vpop.permute.xlu0 %1562 }
 0x5d7   :  { %v1573_v12 = vsub.f32 %v3132_v16, %v1563_v14 }
 0x5d9   :  { %v1577_v45 = vmax.f32 %v1573_v12, 0.0 }
 0x5da   :  { %v1589_v46 = vpop.permute.xlu0 %1588 }
 0x5db   :  { %v1561_v18 = vpop.permute.xlu1 %1560  ;;  %v1581_v6 = vadd.f32 1e-05, %v1577_v45 }
 0x5dc   :  { %v1572_v20 = vsub.f32 %v1548_v61, %v1561_v18 }
 0x5dd   :  { %1928 = vrsqrt.f32 %v1581_v6 }
 0x5de   :  { %v1576_v34 = vmax.f32 %v1572_v20, 0.0  ;;  %v1593_v19 = vpop.permute.xlu0 %1592 }
 0x5df   :  { %v1565_v26 = vpop.permute.xlu1 %1564 }
 0x5e0   :  { %v1580_v8 = vadd.f32 1e-05, %v1576_v34  ;;  %v1574_v59 = vsub.f32 %v1550_v11, %v1565_v26 }
 0x5e2   :  { %1930 = vrsqrt.f32 %v1580_v8  ;;  %v1578_v2 = vmax.f32 %v1574_v59, 0.0 }
 0x5e3   :  { %v1567_v24 = vpop.permute.xlu1 %1566 }
 0x5e4   :  { %v1582_v29 = vadd.f32 1e-05, %v1578_v2  ;;  %v1575_v30 = vsub.f32 %v1551_v36, %v1567_v24 }
 0x5e6   :  { %1932 = vrsqrt.f32 %v1582_v29  ;;  %v1579_v32 = vmax.f32 %v1575_v30, 0.0 }
 0x5e7   :  { %v1591_v5 = vpop.permute.xlu1 %1590  ;;  %v1929_v3 = vpop.eup %1928 }
 0x5e8   :  { %v1583_v49 = vadd.f32 1e-05, %v1579_v32  ;;  %v1601_v50 = vmul.f32 %v1929_v3, %v1591_v5 }
 0x5ea   :  { %1934 = vrsqrt.f32 %v1583_v49  ;;  %1610 = vrot.lane.b32.xlu1 %v1601_v50, %s1945_s15 }
 0x5eb   :  { %v1595_v0 = vpop.permute.xlu1 %1594 }
 0x5ec   :  { %v1931_v4 = vpop.eup %1930 }
 0x5ed   :  { %v1600_v41 = vmul.f32 %v1931_v4, %v1589_v46 }
 0x5ef   :  { %1608 = vrot.lane.b32.xlu0 %v1600_v41, %s1945_s15 }
 0x5f0   :  { %v1933_v27 = vpop.eup %1932 }
 0x5f1   :  { %v1602_v7 = vmul.f32 %v1933_v27, %v1593_v19 }
 0x5f3   :  { %1612 = vrot.lane.b32.xlu0 %v1602_v7, %s1945_s15 }
 0x5f4   :  { %v1935_v23 = vpop.eup %1934 }
 0x5f5   :  { %v1603_v39 = vmul.f32 %v1935_v23, %v1595_v0 }
 0x5f7   :  { %1614 = vrot.lane.b32.xlu1 %v1603_v39, %s1945_s15 }
 0x65c   :  { %v1611_v63 = vpop.permute.xlu1 %1610 }
 0x65d   :  { %v1621_v38 = vmul.f32 %v1611_v63, %v3132_v16 }
 0x65f   :  { %1630 = vrot.lane.b32.xlu1 %v1621_v38, %s1956_s14 }
 0x661   :  { %v1609_v28 = vpop.permute.xlu0 %1608 }
 0x662   :  { %v1620_v9 = vmul.f32 %v1609_v28, %v1548_v61 }
 0x664   :  { %1628 = vrot.lane.b32.xlu0 %v1620_v9, %s1956_s14 }
 0x665   :  { %v1613_v17 = vpop.permute.xlu0 %1612 }
 0x666   :  { %v1622_v57 = vmul.f32 %v1613_v17, %v1550_v11 }
 0x668   :  { %1632 = vrot.lane.b32.xlu0 %v1622_v57, %s1956_s14 }
 0x669   :  { %v1615_v31 = vpop.permute.xlu1 %1614 }
 0x66a   :  { %v1623_v44 = vmul.f32 %v1615_v31, %v1551_v36 }
 0x66c   :  { %1645 = vperm.xlu0 %1916, %v1600_v41   ;;  %1634 = vrot.lane.b32.xlu1 %v1623_v44, %s1956_s14 }
 0x670   :  { %1657 = vperm.xlu0 %1916, %v1603_v39   ;;  %1649 = vperm.xlu1 %1917, %v1601_v50  }
 0x674   :  { %1653 = vperm.xlu1 %1917, %v1602_v7   ;;  %1919 = vset.pattern.permute.xlu0 %v1957_v56 }
 0x678   :  { %1918 = vset.pattern.permute.xlu1 %v1957_v56 }
 0x6d1   :  { %v1631_v10 = vpop.permute.xlu1 %1630 }
 0x6d2   :  { %v1641_v16 = vsub.f32 %v2884_v25, %v1631_v10 }
 0x6d4   :  { %1675 = vperm.xlu0 %1919, %v1641_v16  }
 0x6d6   :  { %v1629_v1 = vpop.permute.xlu0 %1628 }
 0x6d7   :  { %v1640_v40 = vsub.f32 %v2877_v33, %v1629_v1 }
 0x6d9   :  { %1670 = vperm.xlu1 %1918, %v1640_v40  }
 0x6da   :  { %v1633_v60 = vpop.permute.xlu0 %1632 }
 0x6db   :  { %v1642_v53 = vsub.f32 %v2891_v54, %v1633_v60 }
 0x6dd   :  { %1680 = vperm.xlu1 %1918, %v1642_v53  }
 0x6de   :  { %v1635_v61 = vpop.permute.xlu1 %1634 }
 0x6df   :  { %v1643_v22 = vsub.f32 %v2898_v21, %v1635_v61 }
 0x6e1   :  { %1685 = vperm.xlu1 %1918, %v1643_v22  }
 0x6eb   :  { %v1646_v13 = vpop.permute.xlu0 %1645 }
 0x6ec   :  { %v1660_v14 = vmul.f32 %v3072_v62, %v1646_v13  ;;  %v1661_v54 = vmul.f32 %v3074_v52, %v1646_v13 }
 0x6ef   :  { %v1650_v58 = vpop.permute.xlu1 %1649  ;;  %v1658_v55 = vpop.permute.xlu0 %1657 }
 0x6f0   :  { %v1662_v11 = vmul.f32 %v3082_v43, %v1650_v58  ;;  %v1663_v25 = vmul.f32 %v3084_v37, %v1650_v58  ;;  %v1666_v29 = vmul.f32 %v3100_v35, %v1658_v55 }
 0x6f3   :  { %v1654_v36 = vpop.permute.xlu1 %1653 }
 0x6f4   :  { %v1664_v26 = vmul.f32 %v3090_v51, %v1654_v36  ;;  %v1665_v43 = vmul.f32 %v3092_v47, %v1654_v36  ;;  %v1667_v51 = vmul.f32 %v3102_v48, %v1658_v55 }
 0x753   :  { %v1676_v15 = vpop.permute.xlu0 %1675 }
 0x754   :  { %v1690_v42 = vadd.f32 %v1676_v15, %v1662_v11  ;;  %v1691_v33 = vadd.f32 %v1676_v15, %v1663_v25 }
 0x756   :  { %v1698_v12 = vmax.f32 %v1690_v42, 0.0  ;;  %v1699_v45 = vmax.f32 %v1691_v33, 0.0 }
 0x758   :  { %v1671_v18 = vpop.permute.xlu1 %1670  ;;  %v1706_v21 = vmin.f32 %v1698_v12, 6.0  ;;  %v1707_v6 = vmin.f32 %v1699_v45, 6.0 }
 0x759   :  { %v1688_v20 = vadd.f32 %v1671_v18, %v1660_v14  ;;  %v1689_v34 = vadd.f32 %v1671_v18, %v1661_v54 }
 0x75a   :  { %1714 = vst [vmem:[%s3211_s5 + $0x10] sm:$0xff] %v1706_v21  ;;  %1715 = vst [vmem:[%s3211_s5 + $0x18] sm:$0xff] %v1707_v6 }
 0x75b   :  { %v1696_v62 = vmax.f32 %v1688_v20, 0.0  ;;  %v1697_v52 = vmax.f32 %v1689_v34, 0.0 }
 0x75c   :  { %v1681_v37 = vpop.permute.xlu1 %1680 }
 0x75d   :  { %v1704_v8 = vmin.f32 %v1696_v62, 6.0  ;;  %v1705_v59 = vmin.f32 %v1697_v52, 6.0  ;;  %v1692_v2 = vadd.f32 %v1681_v37, %v1664_v26  ;;  %v1693_v24 = vadd.f32 %v1681_v37, %v1665_v43 }
 0x75f   :  { %1712 = vst [vmem:[%s3211_s5] sm:$0xff] %v1704_v8  ;;  %1713 = vst [vmem:[%s3211_s5 + $0x8] sm:$0xff] %v1705_v59  ;;  %v1700_v47 = vmax.f32 %v1692_v2, 0.0  ;;  %v1701_v30 = vmax.f32 %v1693_v24, 0.0 }
 0x760   :  { %v1686_v32 = vpop.permute.xlu1 %1685 }
 0x761   :  { %v1708_v5 = vmin.f32 %v1700_v47, 6.0  ;;  %v1709_v3 = vmin.f32 %v1701_v30, 6.0  ;;  %v1694_v49 = vadd.f32 %v1686_v32, %v1666_v29  ;;  %v1695_v46 = vadd.f32 %v1686_v32, %v1667_v51 }
 0x763   :  { %1716 = vst [vmem:[%s3212_s6] sm:$0xff] %v1708_v5  ;;  %1717 = vst [vmem:[%s3212_s6 + $0x8] sm:$0xff] %v1709_v3  ;;  %v1702_v35 = vmax.f32 %v1694_v49, 0.0  ;;  %v1703_v48 = vmax.f32 %v1695_v46, 0.0 }
 0x765   :  { %v1710_v50 = vmin.f32 %v1702_v35, 6.0  ;;  %v1711_v4 = vmin.f32 %v1703_v48, 6.0 }
 0x767   :  { %1718 = vst [vmem:[%s3212_s6 + $0x10] sm:$0xff] %v1710_v50  ;;  %1719 = vst [vmem:[%s3212_s6 + $0x18] sm:$0xff] %v1711_v4 }

</bundles_post_ra>
